<compile_context>
chip_gen: v6e
topology: v6e:2x2x1
jax: 0.10.0
libtpu: 0.0.40
codegen_flags: <defaults>
</compile_context>

<pallas_src>
import functools

import numpy as np
import jax
import jax.numpy as jnp
from jax.experimental import pallas as pl
from jax.experimental.pallas import tpu as pltpu


# ----------------------------------------------------------------------------
# Fused Pallas kernel
# ----------------------------------------------------------------------------

def _style_encoder_kernel(*refs, layer_meta, act):
    """Whole StyleEncoder forward for one batch sample (grid over batch).

    refs = [x_ref, (S, Wband, bias) per conv layer ..., pool_row, head_w,
            head_b, out_ref]
    """
    x_ref = refs[0]
    o_ref = refs[-1]
    prefs = refs[1:-1]

    h = x_ref[0].astype(jnp.bfloat16)                 # (H_pad, W*Cin)
    pi = 0
    for (k, ho_pad) in layer_meta:
        s_ref, w_ref, b_ref = prefs[pi], prefs[pi + 1], prefs[pi + 2]
        pi += 3
        n_out = w_ref.shape[2]
        # One MXU matmul gathers every (row-tap, output-row) pair at once;
        # the one-hot selection is exact in bf16.
        rows_all = jnp.dot(s_ref[...], h,
                           preferred_element_type=jnp.float32
                           ).astype(jnp.bfloat16)     # (k*Ho_pad, W_in*Cin)
        acc = jnp.zeros((ho_pad, n_out), jnp.float32)
        for ki in range(k):                           # k banded-weight matmuls
            acc = acc + jnp.dot(rows_all[ki * ho_pad:(ki + 1) * ho_pad],
                                w_ref[ki],
                                preferred_element_type=jnp.float32)
        out = acc + b_ref[...]                        # f32 epilogue
        if act == "relu":
            out = jnp.maximum(out, 0.0)
        elif act == "lrelu":
            out = jnp.where(out >= 0.0, out, 0.2 * out)
        elif act == "tanh":
            out = jnp.tanh(out)
        # act == 'none': passthrough.
        # TODO(synk): 'prelu'/'selu' activations and norm in {'bn','in','ln',
        #             'adain','sn'} not implemented (StyleEncoder uses 'none').
        h = out.astype(jnp.bfloat16)                  # (Ho_pad, Wo*Cout)

    pool_ref, wh_ref, bh_ref = prefs[pi], prefs[pi + 1], prefs[pi + 2]
    # AdaptiveAvgPool2d(1) + 1x1 head conv: valid-row mask matmul, then the
    # head weights (pool divisor already folded in on the host).
    pooled = jnp.dot(pool_ref[...], h.astype(jnp.float32),
                     preferred_element_type=jnp.float32)       # (1, Wo*C)
    style = jnp.dot(pooled, wh_ref[...],
                    preferred_element_type=jnp.float32) + bh_ref[...]
    o_ref[0] = style.astype(o_ref.dtype)


# ----------------------------------------------------------------------------
# Parameters and host-side (one-time) weight preprocessing
# ----------------------------------------------------------------------------

def style_encoder_specs(n_downsample, input_dim, dim):
    specs = [(input_dim, dim, 7, 1, 3)]
    d = dim
    for _ in range(2):
        specs.append((d, 2 * d, 4, 2, 1))
        d *= 2
    for _ in range(n_downsample - 2):
        specs.append((d, d, 4, 2, 1))
    return specs, d


def init_style_encoder_params(key, n_downsample, input_dim, dim, style_dim):
    specs, out_dim = style_encoder_specs(n_downsample, input_dim, dim)
    convs = []
    for (cin, cout, k, _s, _p) in specs:
        key, kw, kb = jax.random.split(key, 3)
        w = jax.random.normal(kw, (cout, cin, k, k), jnp.float32) * 0.05
        b = jax.random.normal(kb, (cout,), jnp.float32) * 0.05
        convs.append((w, b))
    key, kw, kb = jax.random.split(key, 3)
    head_w = jax.random.normal(kw, (style_dim, out_dim, 1, 1), jnp.float32) * 0.05
    head_b = jax.random.normal(kb, (style_dim,), jnp.float32) * 0.05
    return {"specs": specs, "convs": convs, "head_w": head_w, "head_b": head_b,
            "output_dim": out_dim, "style_dim": style_dim}


def _pad_index(t, size, pad_type):
    if pad_type == "reflect":
        if t < 0:
            return -t
        if t >= size:
            return 2 * (size - 1) - t
        return t
    if pad_type == "replicate":
        return min(max(t, 0), size - 1)
    return t  # 'zero' handled by the caller (taps simply skipped)


def _round_up(x, m):
    return ((x + m - 1) // m) * m


def prepare_kernel_params(params, H, W, pad_type):
    """Build banded conv weights, stacked row-selectors, tiled biases and the
    folded pool+head — all host-side, one time."""
    layer_meta = []
    kernel_args = []
    h_rows, w_cols = H, W
    h_pad = _round_up(h_rows, 8)
    for (w_raw, b_raw), (cin, cout, k, stride, pad) in zip(params["convs"],
                                                           params["specs"]):
        wnp = np.asarray(w_raw, np.float32)          # (Cout, Cin, k, k)
        bnp = np.asarray(b_raw, np.float32)
        Ho = (h_rows + 2 * pad - k) // stride + 1
        Wo = (w_cols + 2 * pad - k) // stride + 1
        Ho_pad = _round_up(Ho, 8)

        # Banded weights: column-tap contraction + column stride + column pad.
        Wb = np.zeros((k, w_cols * cin, Wo * cout), np.float32)
        for ki in range(k):
            for wo in range(Wo):
                for kj in range(k):
                    t = stride * wo + kj - pad
                    if pad_type == "zero" and (t < 0 or t >= w_cols):
                        continue
                    wi = _pad_index(t, w_cols, pad_type)
                    Wb[ki, wi * cin:(wi + 1) * cin,
                       wo * cout:(wo + 1) * cout] += wnp[:, :, ki, kj].T

        # Stacked one-hot row selection: row stride + row pad, all taps in one
        # matrix; each tap block is sublane-padded to a multiple of 8.
        S = np.zeros((k * Ho_pad, h_pad), np.float32)
        for ki in range(k):
            for m in range(Ho):
                t = stride * m + ki - pad
                if pad_type == "zero" and (t < 0 or t >= h_rows):
                    continue
                ri = _pad_index(t, h_rows, pad_type)
                S[ki * Ho_pad + m, ri] = 1.0

        kernel_args.append(jnp.asarray(S, jnp.bfloat16))
        kernel_args.append(jnp.asarray(Wb, jnp.bfloat16))
        kernel_args.append(jnp.asarray(np.tile(bnp, Wo)[None, :], jnp.float32))
        layer_meta.append((k, Ho_pad))
        h_rows, w_cols, h_pad = Ho, Wo, Ho_pad

    # AdaptiveAvgPool2d(1) + 1x1 head: valid-row mask + pool divisor folded
    # into the head weights.
    pool_row = np.zeros((1, h_pad), np.float32)
    pool_row[0, :h_rows] = 1.0
    wh = np.asarray(params["head_w"], np.float32)[:, :, 0, 0]     # (style, C)
    wh_eff = np.tile(wh.T, (w_cols, 1)) / float(h_rows * w_cols)  # (Wo*C, style)
    bh = np.asarray(params["head_b"], np.float32)[None, :]
    kernel_args.append(jnp.asarray(pool_row, jnp.float32))
    kernel_args.append(jnp.asarray(wh_eff, jnp.float32))
    kernel_args.append(jnp.asarray(bh, jnp.float32))
    return tuple(layer_meta), tuple(kernel_args)


# ----------------------------------------------------------------------------
# Forward wrapper
# ----------------------------------------------------------------------------

@functools.partial(jax.jit,
                   static_argnames=("layer_meta", "act", "style_dim"))
def style_encoder_forward(x_nchw, kernel_args, *, layer_meta, act, style_dim):
    """StyleEncoder.forward; returns (N, style_dim, 1, 1) like PyTorch."""
    N, Cin, H, W = x_nchw.shape
    # NCHW -> (N, H_pad, W*Cin) channel-fastest rows (layout plumbing only).
    x_flat = jnp.transpose(x_nchw, (0, 2, 3, 1)).reshape(N, H, W * Cin)
    H_pad = _round_up(H, 8)
    if H_pad != H:
        x_flat = jnp.pad(x_flat, ((0, 0), (0, H_pad - H), (0, 0)))

    in_specs = [pl.BlockSpec((1, H_pad, W * Cin), lambda n: (n, 0, 0))]
    for arg in kernel_args:
        rank = len(arg.shape)
        in_specs.append(pl.BlockSpec(arg.shape, lambda n, _r=rank: (0,) * _r))

    kern = functools.partial(_style_encoder_kernel, layer_meta=layer_meta,
                             act=act)
    out = pl.pallas_call(
        kern,
        out_shape=jax.ShapeDtypeStruct((N, 1, style_dim), jnp.float32),
        grid=(N,),
        in_specs=in_specs,
        out_specs=pl.BlockSpec((1, 1, style_dim), lambda n: (n, 0, 0)),
        compiler_params=pltpu.CompilerParams(
            dimension_semantics=("parallel",)),
    )(x_flat, *kernel_args)
    return out.reshape(N, style_dim, 1, 1)


# ----------------------------------------------------------------------------
# Pure-JAX reference (f32) for a correctness cross-check
# ----------------------------------------------------------------------------

def reference_forward(x_nchw, params, act, pad_type):
    mode = {"reflect": "reflect", "replicate": "edge", "zero": "constant"}[pad_type]
    x = x_nchw
    for (w, b), (_cin, _cout, _k, stride, pad) in zip(params["convs"],
                                                      params["specs"]):
        xp = jnp.pad(x, ((0, 0), (0, 0), (pad, pad), (pad, pad)), mode=mode)
        x = jax.lax.conv_general_dilated(
            xp, w, window_strides=(stride, stride), padding="VALID",
            dimension_numbers=("NCHW", "OIHW", "NCHW"),
            precision=jax.lax.Precision.HIGHEST)
        x = x + b.reshape(1, -1, 1, 1)
        if act == "relu":
            x = jnp.maximum(x, 0.0)
        elif act == "lrelu":
            x = jnp.where(x >= 0.0, x, 0.2 * x)
        elif act == "tanh":
            x = jnp.tanh(x)
    x = jnp.mean(x, axis=(2, 3), keepdims=True)          # AdaptiveAvgPool2d(1)
    wh = params["head_w"][:, :, 0, 0]
    x = jnp.einsum("ncij,oc->noij", x, wh,
                   precision=jax.lax.Precision.HIGHEST)
    return x + params["head_b"].reshape(1, -1, 1, 1)


# ----------------------------------------------------------------------------
# Demo
# ----------------------------------------------------------------------------

if __name__ == "__main__":
    # MUNIT StyleEncoder config (norm='none', activ='relu', pad_type='reflect'),
    # scaled down: n_downsample=2, input_dim=4, dim=8, style_dim=8, 16x16 input.
    n_downsample, input_dim, dim, style_dim = 2, 4, 8, 8
    act, pad_type = "relu", "reflect"
    N, H, W = 2, 16, 16

    key = jax.random.PRNGKey(0)
    key, kx, kp = jax.random.split(key, 3)
    x = jax.random.normal(kx, (N, input_dim, H, W), jnp.float32)

    params = init_style_encoder_params(kp, n_downsample, input_dim, dim, style_dim)
    layer_meta, kernel_args = prepare_kernel_params(params, H, W, pad_type)

    out = style_encoder_forward(x, kernel_args, layer_meta=layer_meta, act=act,
                                style_dim=style_dim)
    out = jax.block_until_ready(out)

    assert out.shape == (N, style_dim, 1, 1), out.shape
    assert bool(jnp.all(jnp.isfinite(out)))

    # Cross-check against a pure-JAX f32 reference of the same module
    # (kernel runs the matmuls in bf16, hence the loose tolerance).
    ref = jax.block_until_ready(reference_forward(x, params, act, pad_type))
    err = float(jnp.max(jnp.abs(out - ref)))
    scale = float(jnp.max(jnp.abs(ref)))
    assert err <= 0.05 * scale + 2e-3, ("mismatch vs reference", err, scale)

    print("KERNEL_OK")
</pallas_src>

<mosaic_0001>
module attributes {stable_mosaic.version = 11 : i64} {
  func.func @_style_encoder_kernel(%arg0: i32, %arg1: memref<1x16x64xf32, #tpu.memory_space<vmem>>, %arg2: memref<112x16xbf16, #tpu.memory_space<vmem>>, %arg3: memref<7x64x128xbf16, #tpu.memory_space<vmem>>, %arg4: memref<1x128xf32, #tpu.memory_space<vmem>>, %arg5: memref<32x16xbf16, #tpu.memory_space<vmem>>, %arg6: memref<4x128x128xbf16, #tpu.memory_space<vmem>>, %arg7: memref<1x128xf32, #tpu.memory_space<vmem>>, %arg8: memref<32x8xbf16, #tpu.memory_space<vmem>>, %arg9: memref<4x128x128xbf16, #tpu.memory_space<vmem>>, %arg10: memref<1x128xf32, #tpu.memory_space<vmem>>, %arg11: memref<1x8xf32, #tpu.memory_space<vmem>>, %arg12: memref<128x8xf32, #tpu.memory_space<vmem>>, %arg13: memref<1x8xf32, #tpu.memory_space<vmem>>, %arg14: memref<1x1x8xf32, #tpu.memory_space<vmem>>) attributes {dimension_semantics = [#tpu.dimension_semantics<parallel>], iteration_bounds = array<i64: 2>, scalar_prefetch = 0 : i64, scratch_operands = 0 : i64, tpu.core_type = #tpu.core_type<tc>, window_params = [{transform_indices = @transform_0, window_bounds = array<i64: 1, 16, 64>}, {pipeline_mode = #tpu.pipeline_mode<synchronous>, transform_indices = @transform_1, window_bounds = array<i64: 112, 16>}, {pipeline_mode = #tpu.pipeline_mode<synchronous>, transform_indices = @transform_2, window_bounds = array<i64: 7, 64, 128>}, {pipeline_mode = #tpu.pipeline_mode<synchronous>, transform_indices = @transform_3, window_bounds = array<i64: 1, 128>}, {pipeline_mode = #tpu.pipeline_mode<synchronous>, transform_indices = @transform_4, window_bounds = array<i64: 32, 16>}, {pipeline_mode = #tpu.pipeline_mode<synchronous>, transform_indices = @transform_5, window_bounds = array<i64: 4, 128, 128>}, {pipeline_mode = #tpu.pipeline_mode<synchronous>, transform_indices = @transform_6, window_bounds = array<i64: 1, 128>}, {pipeline_mode = #tpu.pipeline_mode<synchronous>, transform_indices = @transform_7, window_bounds = array<i64: 32, 8>}, {pipeline_mode = #tpu.pipeline_mode<synchronous>, transform_indices = @transform_8, window_bounds = array<i64: 4, 128, 128>}, {pipeline_mode = #tpu.pipeline_mode<synchronous>, transform_indices = @transform_9, window_bounds = array<i64: 1, 128>}, {pipeline_mode = #tpu.pipeline_mode<synchronous>, transform_indices = @transform_10, window_bounds = array<i64: 1, 8>}, {pipeline_mode = #tpu.pipeline_mode<synchronous>, transform_indices = @transform_11, window_bounds = array<i64: 128, 8>}, {pipeline_mode = #tpu.pipeline_mode<synchronous>, transform_indices = @transform_12, window_bounds = array<i64: 1, 8>}, {transform_indices = @transform_13, window_bounds = array<i64: 1, 1, 8>}]} {
    %c0 = arith.constant 0 : index
    %c0_0 = arith.constant 0 : index
    %c0_1 = arith.constant 0 : index
    %0 = vector.load %arg1[%c0, %c0_0, %c0_1] : memref<1x16x64xf32, #tpu.memory_space<vmem>>, vector<1x16x64xf32>
    %1 = vector.shape_cast %0 : vector<1x16x64xf32> to vector<16x64xf32>
    %2 = arith.truncf %1 : vector<16x64xf32> to vector<16x64xbf16>
    %c0_2 = arith.constant 0 : index
    %c0_3 = arith.constant 0 : index
    %3 = vector.load %arg2[%c0_2, %c0_3] : memref<112x16xbf16, #tpu.memory_space<vmem>>, vector<112x16xbf16>
    %cst = arith.constant dense<0.000000e+00> : vector<112x64xf32>
    %4 = tpu.matmul %3, %2, %cst {dimension_numbers = #tpu.dot_dimension_numbers<[1], [0], [0], [1], [0, 0, 1, 1], [], []>} : vector<112x16xbf16>, vector<16x64xbf16>, vector<112x64xf32> -> vector<112x64xf32>
    %5 = arith.truncf %4 : vector<112x64xf32> to vector<112x64xbf16>
    %cst_4 = arith.constant 0.000000e+00 : f32
    %6 = vector.broadcast %cst_4 : f32 to vector<16x128xf32>
    %7 = vector.extract_strided_slice %5 {offsets = [0, 0], sizes = [16, 64], strides = [1, 1]} : vector<112x64xbf16> to vector<16x64xbf16>
    %c0_5 = arith.constant 0 : index
    %c0_6 = arith.constant 0 : index
    %c0_7 = arith.constant 0 : index
    %8 = vector.load %arg3[%c0_5, %c0_6, %c0_7] : memref<7x64x128xbf16, #tpu.memory_space<vmem>>, vector<1x64x128xbf16>
    %9 = vector.shape_cast %8 : vector<1x64x128xbf16> to vector<64x128xbf16>
    %cst_8 = arith.constant dense<0.000000e+00> : vector<16x128xf32>
    %10 = tpu.matmul %7, %9, %cst_8 {dimension_numbers = #tpu.dot_dimension_numbers<[1], [0], [0], [1], [0, 0, 1, 1], [], []>} : vector<16x64xbf16>, vector<64x128xbf16>, vector<16x128xf32> -> vector<16x128xf32>
    %11 = arith.addf %6, %10 : vector<16x128xf32>
    %12 = vector.extract_strided_slice %5 {offsets = [16, 0], sizes = [16, 64], strides = [1, 1]} : vector<112x64xbf16> to vector<16x64xbf16>
    %c1 = arith.constant 1 : index
    %c0_9 = arith.constant 0 : index
    %c0_10 = arith.constant 0 : index
    %13 = vector.load %arg3[%c1, %c0_9, %c0_10] : memref<7x64x128xbf16, #tpu.memory_space<vmem>>, vector<1x64x128xbf16>
    %14 = vector.shape_cast %13 : vector<1x64x128xbf16> to vector<64x128xbf16>
    %cst_11 = arith.constant dense<0.000000e+00> : vector<16x128xf32>
    %15 = tpu.matmul %12, %14, %cst_11 {dimension_numbers = #tpu.dot_dimension_numbers<[1], [0], [0], [1], [0, 0, 1, 1], [], []>} : vector<16x64xbf16>, vector<64x128xbf16>, vector<16x128xf32> -> vector<16x128xf32>
    %16 = arith.addf %11, %15 : vector<16x128xf32>
    %17 = vector.extract_strided_slice %5 {offsets = [32, 0], sizes = [16, 64], strides = [1, 1]} : vector<112x64xbf16> to vector<16x64xbf16>
    %c2 = arith.constant 2 : index
    %c0_12 = arith.constant 0 : index
    %c0_13 = arith.constant 0 : index
    %18 = vector.load %arg3[%c2, %c0_12, %c0_13] : memref<7x64x128xbf16, #tpu.memory_space<vmem>>, vector<1x64x128xbf16>
    %19 = vector.shape_cast %18 : vector<1x64x128xbf16> to vector<64x128xbf16>
    %cst_14 = arith.constant dense<0.000000e+00> : vector<16x128xf32>
    %20 = tpu.matmul %17, %19, %cst_14 {dimension_numbers = #tpu.dot_dimension_numbers<[1], [0], [0], [1], [0, 0, 1, 1], [], []>} : vector<16x64xbf16>, vector<64x128xbf16>, vector<16x128xf32> -> vector<16x128xf32>
    %21 = arith.addf %16, %20 : vector<16x128xf32>
    %22 = vector.extract_strided_slice %5 {offsets = [48, 0], sizes = [16, 64], strides = [1, 1]} : vector<112x64xbf16> to vector<16x64xbf16>
    %c3 = arith.constant 3 : index
    %c0_15 = arith.constant 0 : index
    %c0_16 = arith.constant 0 : index
    %23 = vector.load %arg3[%c3, %c0_15, %c0_16] : memref<7x64x128xbf16, #tpu.memory_space<vmem>>, vector<1x64x128xbf16>
    %24 = vector.shape_cast %23 : vector<1x64x128xbf16> to vector<64x128xbf16>
    %cst_17 = arith.constant dense<0.000000e+00> : vector<16x128xf32>
    %25 = tpu.matmul %22, %24, %cst_17 {dimension_numbers = #tpu.dot_dimension_numbers<[1], [0], [0], [1], [0, 0, 1, 1], [], []>} : vector<16x64xbf16>, vector<64x128xbf16>, vector<16x128xf32> -> vector<16x128xf32>
    %26 = arith.addf %21, %25 : vector<16x128xf32>
    %27 = vector.extract_strided_slice %5 {offsets = [64, 0], sizes = [16, 64], strides = [1, 1]} : vector<112x64xbf16> to vector<16x64xbf16>
    %c4 = arith.constant 4 : index
    %c0_18 = arith.constant 0 : index
    %c0_19 = arith.constant 0 : index
    %28 = vector.load %arg3[%c4, %c0_18, %c0_19] : memref<7x64x128xbf16, #tpu.memory_space<vmem>>, vector<1x64x128xbf16>
    %29 = vector.shape_cast %28 : vector<1x64x128xbf16> to vector<64x128xbf16>
    %cst_20 = arith.constant dense<0.000000e+00> : vector<16x128xf32>
    %30 = tpu.matmul %27, %29, %cst_20 {dimension_numbers = #tpu.dot_dimension_numbers<[1], [0], [0], [1], [0, 0, 1, 1], [], []>} : vector<16x64xbf16>, vector<64x128xbf16>, vector<16x128xf32> -> vector<16x128xf32>
    %31 = arith.addf %26, %30 : vector<16x128xf32>
    %32 = vector.extract_strided_slice %5 {offsets = [80, 0], sizes = [16, 64], strides = [1, 1]} : vector<112x64xbf16> to vector<16x64xbf16>
    %c5 = arith.constant 5 : index
    %c0_21 = arith.constant 0 : index
    %c0_22 = arith.constant 0 : index
    %33 = vector.load %arg3[%c5, %c0_21, %c0_22] : memref<7x64x128xbf16, #tpu.memory_space<vmem>>, vector<1x64x128xbf16>
    %34 = vector.shape_cast %33 : vector<1x64x128xbf16> to vector<64x128xbf16>
    %cst_23 = arith.constant dense<0.000000e+00> : vector<16x128xf32>
    %35 = tpu.matmul %32, %34, %cst_23 {dimension_numbers = #tpu.dot_dimension_numbers<[1], [0], [0], [1], [0, 0, 1, 1], [], []>} : vector<16x64xbf16>, vector<64x128xbf16>, vector<16x128xf32> -> vector<16x128xf32>
    %36 = arith.addf %31, %35 : vector<16x128xf32>
    %37 = vector.extract_strided_slice %5 {offsets = [96, 0], sizes = [16, 64], strides = [1, 1]} : vector<112x64xbf16> to vector<16x64xbf16>
    %c6 = arith.constant 6 : index
    %c0_24 = arith.constant 0 : index
    %c0_25 = arith.constant 0 : index
    %38 = vector.load %arg3[%c6, %c0_24, %c0_25] : memref<7x64x128xbf16, #tpu.memory_space<vmem>>, vector<1x64x128xbf16>
    %39 = vector.shape_cast %38 : vector<1x64x128xbf16> to vector<64x128xbf16>
    %cst_26 = arith.constant dense<0.000000e+00> : vector<16x128xf32>
    %40 = tpu.matmul %37, %39, %cst_26 {dimension_numbers = #tpu.dot_dimension_numbers<[1], [0], [0], [1], [0, 0, 1, 1], [], []>} : vector<16x64xbf16>, vector<64x128xbf16>, vector<16x128xf32> -> vector<16x128xf32>
    %41 = arith.addf %36, %40 : vector<16x128xf32>
    %c0_27 = arith.constant 0 : index
    %c0_28 = arith.constant 0 : index
    %42 = vector.load %arg4[%c0_27, %c0_28] : memref<1x128xf32, #tpu.memory_space<vmem>>, vector<1x128xf32>
    %43 = vector.broadcast %42 : vector<1x128xf32> to vector<16x128xf32>
    %44 = arith.addf %41, %43 : vector<16x128xf32>
    %cst_29 = arith.constant 0.000000e+00 : f32
    %45 = vector.broadcast %cst_29 : f32 to vector<16x128xf32>
    %46 = arith.maximumf %44, %45 : vector<16x128xf32>
    %47 = arith.truncf %46 : vector<16x128xf32> to vector<16x128xbf16>
    %c0_30 = arith.constant 0 : index
    %c0_31 = arith.constant 0 : index
    %48 = vector.load %arg5[%c0_30, %c0_31] : memref<32x16xbf16, #tpu.memory_space<vmem>>, vector<32x16xbf16>
    %cst_32 = arith.constant dense<0.000000e+00> : vector<32x128xf32>
    %49 = tpu.matmul %48, %47, %cst_32 {dimension_numbers = #tpu.dot_dimension_numbers<[1], [0], [0], [1], [0, 0, 1, 1], [], []>} : vector<32x16xbf16>, vector<16x128xbf16>, vector<32x128xf32> -> vector<32x128xf32>
    %50 = arith.truncf %49 : vector<32x128xf32> to vector<32x128xbf16>
    %cst_33 = arith.constant 0.000000e+00 : f32
    %51 = vector.broadcast %cst_33 : f32 to vector<8x128xf32>
    %52 = vector.extract_strided_slice %50 {offsets = [0, 0], sizes = [8, 128], strides = [1, 1]} : vector<32x128xbf16> to vector<8x128xbf16>
    %c0_34 = arith.constant 0 : index
    %c0_35 = arith.constant 0 : index
    %c0_36 = arith.constant 0 : index
    %53 = vector.load %arg6[%c0_34, %c0_35, %c0_36] : memref<4x128x128xbf16, #tpu.memory_space<vmem>>, vector<1x128x128xbf16>
    %54 = vector.shape_cast %53 : vector<1x128x128xbf16> to vector<128x128xbf16>
    %cst_37 = arith.constant dense<0.000000e+00> : vector<8x128xf32>
    %55 = tpu.matmul %52, %54, %cst_37 {dimension_numbers = #tpu.dot_dimension_numbers<[1], [0], [0], [1], [0, 0, 1, 1], [], []>} : vector<8x128xbf16>, vector<128x128xbf16>, vector<8x128xf32> -> vector<8x128xf32>
    %56 = arith.addf %51, %55 : vector<8x128xf32>
    %57 = vector.extract_strided_slice %50 {offsets = [8, 0], sizes = [8, 128], strides = [1, 1]} : vector<32x128xbf16> to vector<8x128xbf16>
    %c1_38 = arith.constant 1 : index
    %c0_39 = arith.constant 0 : index
    %c0_40 = arith.constant 0 : index
    %58 = vector.load %arg6[%c1_38, %c0_39, %c0_40] : memref<4x128x128xbf16, #tpu.memory_space<vmem>>, vector<1x128x128xbf16>
    %59 = vector.shape_cast %58 : vector<1x128x128xbf16> to vector<128x128xbf16>
    %cst_41 = arith.constant dense<0.000000e+00> : vector<8x128xf32>
    %60 = tpu.matmul %57, %59, %cst_41 {dimension_numbers = #tpu.dot_dimension_numbers<[1], [0], [0], [1], [0, 0, 1, 1], [], []>} : vector<8x128xbf16>, vector<128x128xbf16>, vector<8x128xf32> -> vector<8x128xf32>
    %61 = arith.addf %56, %60 : vector<8x128xf32>
    %62 = vector.extract_strided_slice %50 {offsets = [16, 0], sizes = [8, 128], strides = [1, 1]} : vector<32x128xbf16> to vector<8x128xbf16>
    %c2_42 = arith.constant 2 : index
    %c0_43 = arith.constant 0 : index
    %c0_44 = arith.constant 0 : index
    %63 = vector.load %arg6[%c2_42, %c0_43, %c0_44] : memref<4x128x128xbf16, #tpu.memory_space<vmem>>, vector<1x128x128xbf16>
    %64 = vector.shape_cast %63 : vector<1x128x128xbf16> to vector<128x128xbf16>
    %cst_45 = arith.constant dense<0.000000e+00> : vector<8x128xf32>
    %65 = tpu.matmul %62, %64, %cst_45 {dimension_numbers = #tpu.dot_dimension_numbers<[1], [0], [0], [1], [0, 0, 1, 1], [], []>} : vector<8x128xbf16>, vector<128x128xbf16>, vector<8x128xf32> -> vector<8x128xf32>
    %66 = arith.addf %61, %65 : vector<8x128xf32>
    %67 = vector.extract_strided_slice %50 {offsets = [24, 0], sizes = [8, 128], strides = [1, 1]} : vector<32x128xbf16> to vector<8x128xbf16>
    %c3_46 = arith.constant 3 : index
    %c0_47 = arith.constant 0 : index
    %c0_48 = arith.constant 0 : index
    %68 = vector.load %arg6[%c3_46, %c0_47, %c0_48] : memref<4x128x128xbf16, #tpu.memory_space<vmem>>, vector<1x128x128xbf16>
    %69 = vector.shape_cast %68 : vector<1x128x128xbf16> to vector<128x128xbf16>
    %cst_49 = arith.constant dense<0.000000e+00> : vector<8x128xf32>
    %70 = tpu.matmul %67, %69, %cst_49 {dimension_numbers = #tpu.dot_dimension_numbers<[1], [0], [0], [1], [0, 0, 1, 1], [], []>} : vector<8x128xbf16>, vector<128x128xbf16>, vector<8x128xf32> -> vector<8x128xf32>
    %71 = arith.addf %66, %70 : vector<8x128xf32>
    %c0_50 = arith.constant 0 : index
    %c0_51 = arith.constant 0 : index
    %72 = vector.load %arg7[%c0_50, %c0_51] : memref<1x128xf32, #tpu.memory_space<vmem>>, vector<1x128xf32>
    %73 = vector.broadcast %72 : vector<1x128xf32> to vector<8x128xf32>
    %74 = arith.addf %71, %73 : vector<8x128xf32>
    %cst_52 = arith.constant 0.000000e+00 : f32
    %75 = vector.broadcast %cst_52 : f32 to vector<8x128xf32>
    %76 = arith.maximumf %74, %75 : vector<8x128xf32>
    %77 = arith.truncf %76 : vector<8x128xf32> to vector<8x128xbf16>
    %c0_53 = arith.constant 0 : index
    %c0_54 = arith.constant 0 : index
    %78 = vector.load %arg8[%c0_53, %c0_54] : memref<32x8xbf16, #tpu.memory_space<vmem>>, vector<32x8xbf16>
    %cst_55 = arith.constant dense<0.000000e+00> : vector<32x128xf32>
    %79 = tpu.matmul %78, %77, %cst_55 {dimension_numbers = #tpu.dot_dimension_numbers<[1], [0], [0], [1], [0, 0, 1, 1], [], []>} : vector<32x8xbf16>, vector<8x128xbf16>, vector<32x128xf32> -> vector<32x128xf32>
    %80 = arith.truncf %79 : vector<32x128xf32> to vector<32x128xbf16>
    %cst_56 = arith.constant 0.000000e+00 : f32
    %81 = vector.broadcast %cst_56 : f32 to vector<8x128xf32>
    %82 = vector.extract_strided_slice %80 {offsets = [0, 0], sizes = [8, 128], strides = [1, 1]} : vector<32x128xbf16> to vector<8x128xbf16>
    %c0_57 = arith.constant 0 : index
    %c0_58 = arith.constant 0 : index
    %c0_59 = arith.constant 0 : index
    %83 = vector.load %arg9[%c0_57, %c0_58, %c0_59] : memref<4x128x128xbf16, #tpu.memory_space<vmem>>, vector<1x128x128xbf16>
    %84 = vector.shape_cast %83 : vector<1x128x128xbf16> to vector<128x128xbf16>
    %cst_60 = arith.constant dense<0.000000e+00> : vector<8x128xf32>
    %85 = tpu.matmul %82, %84, %cst_60 {dimension_numbers = #tpu.dot_dimension_numbers<[1], [0], [0], [1], [0, 0, 1, 1], [], []>} : vector<8x128xbf16>, vector<128x128xbf16>, vector<8x128xf32> -> vector<8x128xf32>
    %86 = arith.addf %81, %85 : vector<8x128xf32>
    %87 = vector.extract_strided_slice %80 {offsets = [8, 0], sizes = [8, 128], strides = [1, 1]} : vector<32x128xbf16> to vector<8x128xbf16>
    %c1_61 = arith.constant 1 : index
    %c0_62 = arith.constant 0 : index
    %c0_63 = arith.constant 0 : index
    %88 = vector.load %arg9[%c1_61, %c0_62, %c0_63] : memref<4x128x128xbf16, #tpu.memory_space<vmem>>, vector<1x128x128xbf16>
    %89 = vector.shape_cast %88 : vector<1x128x128xbf16> to vector<128x128xbf16>
    %cst_64 = arith.constant dense<0.000000e+00> : vector<8x128xf32>
    %90 = tpu.matmul %87, %89, %cst_64 {dimension_numbers = #tpu.dot_dimension_numbers<[1], [0], [0], [1], [0, 0, 1, 1], [], []>} : vector<8x128xbf16>, vector<128x128xbf16>, vector<8x128xf32> -> vector<8x128xf32>
    %91 = arith.addf %86, %90 : vector<8x128xf32>
    %92 = vector.extract_strided_slice %80 {offsets = [16, 0], sizes = [8, 128], strides = [1, 1]} : vector<32x128xbf16> to vector<8x128xbf16>
    %c2_65 = arith.constant 2 : index
    %c0_66 = arith.constant 0 : index
    %c0_67 = arith.constant 0 : index
    %93 = vector.load %arg9[%c2_65, %c0_66, %c0_67] : memref<4x128x128xbf16, #tpu.memory_space<vmem>>, vector<1x128x128xbf16>
    %94 = vector.shape_cast %93 : vector<1x128x128xbf16> to vector<128x128xbf16>
    %cst_68 = arith.constant dense<0.000000e+00> : vector<8x128xf32>
    %95 = tpu.matmul %92, %94, %cst_68 {dimension_numbers = #tpu.dot_dimension_numbers<[1], [0], [0], [1], [0, 0, 1, 1], [], []>} : vector<8x128xbf16>, vector<128x128xbf16>, vector<8x128xf32> -> vector<8x128xf32>
    %96 = arith.addf %91, %95 : vector<8x128xf32>
    %97 = vector.extract_strided_slice %80 {offsets = [24, 0], sizes = [8, 128], strides = [1, 1]} : vector<32x128xbf16> to vector<8x128xbf16>
    %c3_69 = arith.constant 3 : index
    %c0_70 = arith.constant 0 : index
    %c0_71 = arith.constant 0 : index
    %98 = vector.load %arg9[%c3_69, %c0_70, %c0_71] : memref<4x128x128xbf16, #tpu.memory_space<vmem>>, vector<1x128x128xbf16>
    %99 = vector.shape_cast %98 : vector<1x128x128xbf16> to vector<128x128xbf16>
    %cst_72 = arith.constant dense<0.000000e+00> : vector<8x128xf32>
    %100 = tpu.matmul %97, %99, %cst_72 {dimension_numbers = #tpu.dot_dimension_numbers<[1], [0], [0], [1], [0, 0, 1, 1], [], []>} : vector<8x128xbf16>, vector<128x128xbf16>, vector<8x128xf32> -> vector<8x128xf32>
    %101 = arith.addf %96, %100 : vector<8x128xf32>
    %c0_73 = arith.constant 0 : index
    %c0_74 = arith.constant 0 : index
    %102 = vector.load %arg10[%c0_73, %c0_74] : memref<1x128xf32, #tpu.memory_space<vmem>>, vector<1x128xf32>
    %103 = vector.broadcast %102 : vector<1x128xf32> to vector<8x128xf32>
    %104 = arith.addf %101, %103 : vector<8x128xf32>
    %cst_75 = arith.constant 0.000000e+00 : f32
    %105 = vector.broadcast %cst_75 : f32 to vector<8x128xf32>
    %106 = arith.maximumf %104, %105 : vector<8x128xf32>
    %107 = arith.truncf %106 : vector<8x128xf32> to vector<8x128xbf16>
    %c0_76 = arith.constant 0 : index
    %c0_77 = arith.constant 0 : index
    %108 = vector.load %arg11[%c0_76, %c0_77] : memref<1x8xf32, #tpu.memory_space<vmem>>, vector<1x8xf32>
    %109 = arith.extf %107 : vector<8x128xbf16> to vector<8x128xf32>
    %cst_78 = arith.constant dense<0.000000e+00> : vector<1x128xf32>
    %110 = tpu.matmul %108, %109, %cst_78 {dimension_numbers = #tpu.dot_dimension_numbers<[1], [0], [0], [1], [0, 0, 1, 1], [], []>} : vector<1x8xf32>, vector<8x128xf32>, vector<1x128xf32> -> vector<1x128xf32>
    %c0_79 = arith.constant 0 : index
    %c0_80 = arith.constant 0 : index
    %111 = vector.load %arg12[%c0_79, %c0_80] : memref<128x8xf32, #tpu.memory_space<vmem>>, vector<128x8xf32>
    %cst_81 = arith.constant dense<0.000000e+00> : vector<1x8xf32>
    %112 = tpu.matmul %110, %111, %cst_81 {dimension_numbers = #tpu.dot_dimension_numbers<[1], [0], [0], [1], [0, 0, 1, 1], [], []>} : vector<1x128xf32>, vector<128x8xf32>, vector<1x8xf32> -> vector<1x8xf32>
    %c0_82 = arith.constant 0 : index
    %c0_83 = arith.constant 0 : index
    %113 = vector.load %arg13[%c0_82, %c0_83] : memref<1x8xf32, #tpu.memory_space<vmem>>, vector<1x8xf32>
    %114 = arith.addf %112, %113 : vector<1x8xf32>
    %c0_84 = arith.constant 0 : index
    %c0_85 = arith.constant 0 : index
    %c0_86 = arith.constant 0 : index
    %115 = vector.load %arg14[%c0_84, %c0_85, %c0_86] : memref<1x1x8xf32, #tpu.memory_space<vmem>>, vector<1x1x8xf32>
    %116 = vector.shape_cast %115 : vector<1x1x8xf32> to vector<1x8xf32>
    %117 = vector.shape_cast %114 : vector<1x8xf32> to vector<1x1x8xf32>
    tpu.vector_store %arg14[%c0_84, %c0_85, %c0_86], %117 {strides = array<i32>} : memref<1x1x8xf32, #tpu.memory_space<vmem>>, vector<1x1x8xf32>,
    return
  }
  func.func @transform_0(%arg0: i32) -> (i32, i32, i32) {
    %c0_i32 = arith.constant 0 : i32
    %c0_i32_0 = arith.constant 0 : i32
    %c0_i32_1 = arith.constant 0 : i32
    return %arg0, %c0_i32, %c0_i32_0 : i32, i32, i32
  }
  func.func @transform_1(%arg0: i32) -> (i32, i32) {
    %c0_i32 = arith.constant 0 : i32
    %c0_i32_0 = arith.constant 0 : i32
    %c0_i32_1 = arith.constant 0 : i32
    return %c0_i32, %c0_i32_0 : i32, i32
  }
  func.func @transform_2(%arg0: i32) -> (i32, i32, i32) {
    %c0_i32 = arith.constant 0 : i32
    %c0_i32_0 = arith.constant 0 : i32
    %c0_i32_1 = arith.constant 0 : i32
    %c0_i32_2 = arith.constant 0 : i32
    return %c0_i32, %c0_i32_0, %c0_i32_1 : i32, i32, i32
  }
  func.func @transform_3(%arg0: i32) -> (i32, i32) {
    %c0_i32 = arith.constant 0 : i32
    %c0_i32_0 = arith.constant 0 : i32
    %c0_i32_1 = arith.constant 0 : i32
    return %c0_i32, %c0_i32_0 : i32, i32
  }
  func.func @transform_4(%arg0: i32) -> (i32, i32) {
    %c0_i32 = arith.constant 0 : i32
    %c0_i32_0 = arith.constant 0 : i32
    %c0_i32_1 = arith.constant 0 : i32
    return %c0_i32, %c0_i32_0 : i32, i32
  }
  func.func @transform_5(%arg0: i32) -> (i32, i32, i32) {
    %c0_i32 = arith.constant 0 : i32
    %c0_i32_0 = arith.constant 0 : i32
    %c0_i32_1 = arith.constant 0 : i32
    %c0_i32_2 = arith.constant 0 : i32
    return %c0_i32, %c0_i32_0, %c0_i32_1 : i32, i32, i32
  }
  func.func @transform_6(%arg0: i32) -> (i32, i32) {
    %c0_i32 = arith.constant 0 : i32
    %c0_i32_0 = arith.constant 0 : i32
    %c0_i32_1 = arith.constant 0 : i32
    return %c0_i32, %c0_i32_0 : i32, i32
  }
  func.func @transform_7(%arg0: i32) -> (i32, i32) {
    %c0_i32 = arith.constant 0 : i32
    %c0_i32_0 = arith.constant 0 : i32
    %c0_i32_1 = arith.constant 0 : i32
    return %c0_i32, %c0_i32_0 : i32, i32
  }
  func.func @transform_8(%arg0: i32) -> (i32, i32, i32) {
    %c0_i32 = arith.constant 0 : i32
    %c0_i32_0 = arith.constant 0 : i32
    %c0_i32_1 = arith.constant 0 : i32
    %c0_i32_2 = arith.constant 0 : i32
    return %c0_i32, %c0_i32_0, %c0_i32_1 : i32, i32, i32
  }
  func.func @transform_9(%arg0: i32) -> (i32, i32) {
    %c0_i32 = arith.constant 0 : i32
    %c0_i32_0 = arith.constant 0 : i32
    %c0_i32_1 = arith.constant 0 : i32
    return %c0_i32, %c0_i32_0 : i32, i32
  }
  func.func @transform_10(%arg0: i32) -> (i32, i32) {
    %c0_i32 = arith.constant 0 : i32
    %c0_i32_0 = arith.constant 0 : i32
    %c0_i32_1 = arith.constant 0 : i32
    return %c0_i32, %c0_i32_0 : i32, i32
  }
  func.func @transform_11(%arg0: i32) -> (i32, i32) {
    %c0_i32 = arith.constant 0 : i32
    %c0_i32_0 = arith.constant 0 : i32
    %c0_i32_1 = arith.constant 0 : i32
    return %c0_i32, %c0_i32_0 : i32, i32
  }
  func.func @transform_12(%arg0: i32) -> (i32, i32) {
    %c0_i32 = arith.constant 0 : i32
    %c0_i32_0 = arith.constant 0 : i32
    %c0_i32_1 = arith.constant 0 : i32
    return %c0_i32, %c0_i32_0 : i32, i32
  }
  func.func @transform_13(%arg0: i32) -> (i32, i32, i32) {
    %c0_i32 = arith.constant 0 : i32
    %c0_i32_0 = arith.constant 0 : i32
    %c0_i32_1 = arith.constant 0 : i32
    return %arg0, %c0_i32, %c0_i32_0 : i32, i32, i32
  }
}

</mosaic_0001>

<bundles_post_ra>
// kernel: style_encoder_forward.1
= control target key start
LH: loop header
LB: loop body
LE: loop exit
PB: predicated region body
PF: predicated region fallthrough
CT: control target
= control target key end

     0   :  { %s4051_s0 = inlined_call_operand.vmem [shape: f32[2,16,64], index: 0, kind: input, shape index: {}]   ;;  %s4052_s1 = inlined_call_operand.vmem [shape: bf16[112,16], index: 1, kind: input, shape index: {}]   ;;  %s4053_s2 = inlined_call_operand.hbm [shape: bf16[7,64,128], index: 2, kind: input, shape index: {}]   ;;  %s4054_s3 = inlined_call_operand.vmem [shape: f32[1,128], index: 3, kind: input, shape index: {}]   ;;  %s4055_s4 = inlined_call_operand.vmem [shape: bf16[32,16], index: 4, kind: input, shape index: {}]   ;;  %s4056_s5 = inlined_call_operand.vmem [shape: bf16[4,128,128], index: 5, kind: input, shape index: {}]   ;;  %s4057_s6 = inlined_call_operand.vmem [shape: f32[1,128], index: 6, kind: input, shape index: {}]   ;;  %s4058_s7 = inlined_call_operand.vmem [shape: bf16[32,8], index: 7, kind: input, shape index: {}]   ;;  %s4059_s8 = inlined_call_operand.vmem [shape: bf16[4,128,128], index: 8, kind: input, shape index: {}]   ;;  %s4060_s9 = inlined_call_operand.vmem [shape: f32[1,128], index: 9, kind: input, shape index: {}]   ;;  %s4061_s10 = inlined_call_operand.vmem [shape: f32[1,8], index: 10, kind: input, shape index: {}]   ;;  %s4062_s11 = inlined_call_operand.vmem [shape: f32[128,8], index: 11, kind: input, shape index: {}]   ;;  %s4063_s12 = inlined_call_operand.vmem [shape: f32[1,8], index: 12, kind: input, shape index: {}]   ;;  %s4064_s13 = inlined_call_operand.hbm [shape: f32[2,1,8], index: 13, kind: output, shape index: {}]  }
   0x1   :  { %4065 = sst [smem:[#allocation8_spill]] %s4051_s0 }
   0x2   :  { %4066 = sst [smem:[#allocation9_spill]] %s4052_s1 }
   0x3   :  { %4067 = sst [smem:[#allocation10_spill]] %s4053_s2 }
   0x4   :  { %18 = vsyncpa [#allocation3], 0 }
   0x5   :  { %19 = vsyncpa [#allocation4], 0 }
   0x6   :  { %21 = vsyncpa [#allocation4 + $0x1], 0  ;;  %s3475_s25 = smov 0   ;;  %s3477_s26 = smov 0  }
   0x7   :  { %s3479_s27 = smov 0   ;;  %s3481_s28 = smov 0  }
   0x8 LB: > { %s3496_s29 = sadd.s32 4294967295, %s3397_s28   ;;  %s2450_s30 = sadd.s32 4294967294, %s3397_s28   ;;  %s3397_s28 = sphi %s3481_s28, %s4078_s28   ;;  %s3393_s27 = sphi %s3479_s27, %s4077_s27   ;;  %s3389_s26 = sphi %s3477_s26, %s4076_s26   ;;  %s3385_s25 = sphi %s3475_s25, %s4075_s25  }
   0x9   : > { %s3500_s14 = sadd.s32 1, %s3397_s28   ;;  %s312_s15 = sadd.s32 1, %s3393_s27 }
   0xa   : > { %s309_s16 = ssub.s32 %s3397_s28, %s3500_s14  ;;  %p322_p0 = scmp.ne.s32.totalorder %s3393_s27, %s3389_s26 }
   0xb   : > { %p310_p1 = scmp.eq.s32.totalorder %s309_s16, 0  ;;  %p323_p2 = scmp.eq.s32.totalorder %s3496_s29, 1 }
   0xc   : > { %p328_p3 = scmp.ne.s32.totalorder %s3389_s26, %s3385_s25  ;;  %p329_p4 = scmp.eq.s32.totalorder %s2450_s30, 1 }
   0xd   : > { %s3511_s17 = scalar_select %p310_p1, %s3393_s27, %s312_s15  }
   0xe   : > { %p3513_p5 = por %p323_p2, %p322_p0  ;;  %p3517_p6 = por %p329_p4, %p328_p3 }
   0xf   : > { %p2451_p7 = scmp.ge.s32.totalorder %s3397_s28, 1  ;;  %p336_p8 = scmp.lt.s32.totalorder %s3397_s28, 3 }
  0x10   : > { %s4069_s19 = scalar_select %p3517_p6, 1, 0 }
  0x11   : > { %p3164_p9 = scmp.eq.s32.totalorder %s3496_s29, 0  ;;  %p3524_p10 = pnand %p2451_p7, %p336_p8 }
  0x12   : > { %s3399_s21 = smov [#allocation2]  }
  0x13   : > { %s351_s22 = sshll.u32 %s3399_s21, 4  ;;  %p3156_p11 = pneg %p3524_p10  ;;  %s352_s22 = int_to_ptr.vmem [resolvable:$true] %s351_s22 }
  0x14   : > { %s3318_s23 = scalar_lea.vmem %s352_s22, 3584  ;;  %p3326_p3 = scmp.lt.s32.totalorder %s352_s22, %s352_s22 }
  0x15   : > { %p3157_p12 = pnand %p3164_p9, %p3156_p11  ;;  %p3319_p0 = scmp.ne.s32.totalorder %s352_s22, %s3318_s23 }
  0x16   : > { %p3327_p4 = scmp.lt.s32.totalorder %s3318_s23, %s3318_s23 }
  0x17   : > { %p3309_p13 = pneg %p3157_p12 }
  0x18   : > { %p3328_p6 = por %p3327_p4, %p3326_p3 }
  0x19   : > { %p3321_p1 = pnand %p3319_p0, %p3309_p13 }
  0x1b   : > { %p3322_p2 = pneg %p3321_p1 }
  0x1d   : > { %p3329_p7 = pnand %p3328_p6, %p3322_p2 }
  0x1f   : > { %3332 = shalt.err (!%p3329_p7)
}
  0x20   : > { %s3400_s24 = smov 64   ;;  %s3401_s30 = smov 4  }
  0x21   : > { %s4071_s2 = sld [smem:[#allocation10_spill]] }
  0x23   : > { %405 = sbr.rel (%p3524_p10) target bundleno = 1794 (0x702), region = 72 }
  0x27   : > { %3159 = dma.hbm_to_vmem [thread:$0]  (!%p3157_p12), %s4071_s2, 3584, %s352_s22, [#allocation3], %s3400_s24, %s3400_s24, %s3401_s30  }
  0x28   : > { %3376 = dma.done.wait (%p3164_p9), [#allocation3], 3584  }
  0x29   : > { %3378 = vsyncadd (%p3164_p9), [#allocation3], 4294963712  ;;  %p448_p8 = scmp.lt.s32.totalorder %s3496_s29, 1  ;;  %v3402_v0 = vmov 0.0   ;;  %vm3403_vm0 = vmmov 0   ;;  %s4072_s0 = sld [smem:[#allocation8_spill]] }
  0x2a   : > { %2823 = vmatprep.subr.bf16.mxu0 %v3402_v0  ;;  %2825 = vmatprep.mubr.msk.bf16.mxu0 %vm3403_vm0, %v3402_v0  ;;  %s4073_s1 = sld [smem:[#allocation9_spill]]  ;;  %vm506_vm1 = vcmask 130048   ;;  %v3211_v6 = vld [vmem:[#allocation2 + $0x38] sm:$0xff]   ;;  %v3212_v7 = vld [vmem:[#allocation2 + $0x30] sm:$0xff]   ;;  %v3215_v15 = vld [vmem:[#allocation2 + $0x8] sm:$0xff]   ;;  %vm665_vm2 = vcmask 523264  }
  0x2b   : > { %s449_s21 = scalar_select %p448_p8, %s3496_s29, 1  ;;  %2865 = vmatprep.subr.bf16.mxu1 %v3402_v0  ;;  %2873 = vmatprep.mubr.msk.bf16.mxu1 %vm3403_vm0, %v3402_v0  ;;  %v3213_v8 = vld [vmem:[#allocation2 + $0x18] sm:$0xff]   ;;  %v3214_v9 = vld [vmem:[#allocation2 + $0x10] sm:$0xff]   ;;  %v3216_v16 = vld [vmem:[#allocation2 + $0x28] sm:$0xff]   ;;  %vm1707_vm3 = vcmask 64512   ;;  %vm1714_vm4 = vcmask 1043456  }
  0x2c   : > { %2866 = vmatpush3.bf16.msra.mxu1 %v3213_v8  ;;  %v3217_v17 = vld [vmem:[#allocation2] sm:$0xff]   ;;  %v3218_v22 = vld [vmem:[#allocation2 + $0x58] sm:$0xff]   ;;  %v3220_v26 = vld [vmem:[#allocation2 + $0x50] sm:$0xff]   ;;  %s446_s23 = sand.u32 1, %s3389_s26   ;;  %s2679_s15 = sshll.u32 %s3496_s29, 4  ;;  %vm2368_vm5 = vcmask 57344  }
  0x2d   : > { %s2682_s20 = sshll.u32 %s449_s21, 4  ;;  %2867 = vmatprep.subr.bf16.mxu1 %v3402_v0  ;;  %v3219_v18 = vld [vmem:[#allocation2 + $0x20] sm:$0xff]   ;;  %v3221_v29 = vld [vmem:[#allocation2 + $0x48] sm:$0xff]   ;;  %v3222_v30 = vld [vmem:[#allocation2 + $0x78] sm:$0xff]   ;;  %s447_s16 = scalar_lea.vmem [#allocation5], %s446_s23 }
  0x2e   : > { %v3223_v34 = vld [vmem:[#allocation2 + $0x40] sm:$0xff]   ;;  %v3224_v35 = vld [vmem:[#allocation2 + $0x70] sm:$0xff]   ;;  %v3225_v38 = vld [vmem:[#allocation2 + $0x68] sm:$0xff]   ;;  %s2383_s21 = sshll.u32 %s447_s16, 4  ;;  %s2371_s22 = scalar_lea.sflag [#allocation4], %s446_s23  ;;  %s2384_s21 = int_to_ptr.vmem [resolvable:$true] %s2383_s21 }
  0x2f   : > { %s452_s24 = scalar_lea.vmem %s4072_s0, %s2682_s20  ;;  %v3226_v39 = vld [vmem:[#allocation2 + $0x98] sm:$0xff]   ;;  %v3227_v43 = vld [vmem:[#allocation2 + $0x60] sm:$0xff]   ;;  %v3228_v44 = vld [vmem:[#allocation2 + $0x90] sm:$0xff]   ;;  %s4016_s20 = scalar_lea.hbm %s4064_s13, %s2679_s15 }
  0x30   : > { %v454_v1 = vld [vmem:[%s452_s24] sm:$0xff]  ;;  %v455_v2 = vld [vmem:[%s452_s24 + $0x8] sm:$0xff]  ;;  %v3206_v10 = vld [vmem:[%s4073_s1 + $0x10] sm:$0xff]   ;;  %2868 = vmatpush3.bf16.msra.mxu1 %v3214_v9  ;;  %s3333_s2 = scalar_lea.vmem %s2384_s21, 16  ;;  %s3404_s29 = smov [#allocation5]  }
  0x31   : > { %v456_v3 = vpack.c.bf16 %v455_v2, %v454_v1  ;;  %v3204_v4 = vld [vmem:[%s4073_s1] sm:$0xff]   ;;  %v3205_v5 = vld [vmem:[%s4073_s1 + $0x8] sm:$0xff]   ;;  %2869 = vmatprep.subr.bf16.mxu1 %v3402_v0  ;;  %v3207_v11 = vld [vmem:[%s4073_s1 + $0x18] sm:$0xff]   ;;  %p3334_p6 = scmp.ne.s32.totalorder %s2384_s21, %s3333_s2  ;;  %s3337_s24 = sshll.u32 %s3404_s29, 4  ;;  %s3338_s24 = int_to_ptr.vmem [resolvable:$false] %s3337_s24 }
  0x32   : > { %v3208_v12 = vld [vmem:[%s4073_s1 + $0x20] sm:$0xff]   ;;  %v3209_v13 = vld [vmem:[%s4073_s1 + $0x28] sm:$0xff]   ;;  %v3210_v14 = vld [vmem:[%s4073_s1 + $0x30] sm:$0xff]   ;;  %s3339_s30 = scalar_lea.vmem %s3338_s24, 32  ;;  %p3340_p11 = scmp.lt.s32.totalorder %s2384_s21, %s3338_s24 }
  0x33   : > { %2824 = vmatpush3.bf16.msra.mxu0 %v456_v3  ;;  %v3229_v47 = vld [vmem:[#allocation2 + $0x88] sm:$0xff]   ;;  %v3230_v48 = vld [vmem:[#allocation2 + $0xb8] sm:$0xff]   ;;  %v3231_v52 = vld [vmem:[#allocation2 + $0x80] sm:$0xff]   ;;  %p3335_p9 = pnand %p3334_p6, %p3513_p5  ;;  %p3341_p12 = scmp.lt.s32.totalorder %s3339_s30, %s3333_s2 }
  0x34   : > { %2853 = vmatprep.subr.bf16.mxu0 %v3402_v0  ;;  %2870 = vmatpush3.bf16.msra.mxu1 %v3215_v15  ;;  %v3232_v53 = vld [vmem:[#allocation2 + $0xb0] sm:$0xff]   ;;  %v3233_v56 = vld [vmem:[#allocation2 + $0xa8] sm:$0xff]   ;;  %v3234_v57 = vld [vmem:[#allocation2 + $0xd8] sm:$0xff]  }
  0x35   : > { %2871 = vmatprep.subr.bf16.mxu1 %v3402_v0  ;;  %v3235_v61 = vld [vmem:[#allocation2 + $0xa0] sm:$0xff]   ;;  %v3236_v62 = vld [vmem:[#allocation2 + $0xd0] sm:$0xff]   ;;  %v3237_v2 = vld [vmem:[#allocation2 + $0xc8] sm:$0xff]   ;;  %p3336_p10 = pneg %p3335_p9  ;;  %p3342_p13 = por %p3341_p12, %p3340_p11 }
  0x36   : > { %2826 = vmatmul.mubr.msk.bf16.vlgmr.msra.gmra.mxu0 %vm506_vm1, %v3204_v4  ;;  %v3248_v15 = vld [vmem:[%s4056_s5 + $0x60] sm:$0xff]  }
  0x37   : > { %2829 = vmatprep.mubr.msk.bf16.mxu0 %vm3403_vm0, %v3402_v0  ;;  %2854 = vmatpush3.bf16.msra.mxu0 %v3211_v6  ;;  %v3238_v6 = vld [vmem:[#allocation2 + $0xc0] sm:$0xff]   ;;  %p3343_p0 = pnand %p3342_p13, %p3336_p10 }
  0x38   : > { %2855 = vmatprep.subr.bf16.mxu0 %v3402_v0  ;;  %2872 = vmatpush3.bf16.msra.mxu1 %v3217_v17  ;;  %v3252_v17 = vld [vmem:[%s4056_s5 + $0x50] sm:$0xff]  }
  0x39   : > { %2877 = vmatprep.subr.bf16.mxu1 %v3402_v0 }
  0x3b   : > { %2856 = vmatpush3.bf16.msra.mxu0 %v3212_v7 }
  0x3c   : > { %2857 = vmatprep.subr.bf16.mxu0 %v3402_v0 }
  0x3e   : > { %2830 = vmatmul.mubr.msk.bf16.gmra.mxu0 %vm506_vm1, %v3205_v5 }
  0x3f   : > { %2833 = vmatprep.mubr.msk.bf16.mxu0 %vm3403_vm0, %v3402_v0  ;;  %2858 = vmatpush3.bf16.msra.mxu0 %v3216_v16  ;;  %v3250_v16 = vld [vmem:[%s4056_s5 + $0x58] sm:$0xff]  }
  0x40   : > { %2859 = vmatprep.subr.bf16.mxu0 %v3402_v0 }
  0x43   : > { %2860 = vmatpush3.bf16.msra.mxu0 %v3219_v18 }
  0x44   : > { %2889 = vmatprep.subr.bf16.mxu0 %v3402_v0 }
  0x46   : > { %2834 = vmatmul.mubr.msk.bf16.gmra.mxu0 %vm506_vm1, %v3206_v10 }
  0x47   : > { %2837 = vmatprep.mubr.msk.bf16.mxu0 %vm3403_vm0, %v3402_v0 }
  0x4e   : > { %2838 = vmatmul.mubr.msk.bf16.gmra.mxu0 %vm506_vm1, %v3207_v11  ;;  %v3239_v11 = vld [vmem:[%s4055_s4] sm:$0xff]  }
  0x4f   : > { %2841 = vmatprep.mubr.msk.bf16.mxu0 %vm3403_vm0, %v3402_v0 }
  0x56   : > { %2842 = vmatmul.mubr.msk.bf16.gmra.mxu0 %vm506_vm1, %v3208_v12  ;;  %v3242_v12 = vld [vmem:[%s4056_s5 + $0x78] sm:$0xff]  }
  0x57   : > { %2845 = vmatprep.mubr.msk.bf16.mxu0 %vm3403_vm0, %v3402_v0 }
  0x5e   : > { %2846 = vmatmul.mubr.msk.bf16.gmra.mxu0 %vm506_vm1, %v3209_v13  ;;  %v3244_v13 = vld [vmem:[%s4056_s5 + $0x70] sm:$0xff]  }
  0x5f   : > { %2849 = vmatprep.mubr.msk.bf16.mxu0 %vm3403_vm0, %v3402_v0 }
  0x66   : > { %2850 = vmatmul.mubr.msk.bf16.gmra.mxu0 %vm506_vm1, %v3210_v14  ;;  %v3246_v14 = vld [vmem:[%s4056_s5 + $0x68] sm:$0xff]  }
  0x67   : > { %2861 = vmatprep.mubr.msk.bf16.mxu0 %vm3403_vm0, %v3402_v0 }
  0xf6   : > { %v562_v19 = vpop.f32.mrf.mxu0 }
  0xf8   : > { %v2827_v20 = vpop.f32.mrf.mxu0 }
  0xfa   : > { %v565_v21 = vpop.f32.mrf.mxu0 }
  0xfb   : > { %v617_v23 = vpack.c.bf16 %v565_v21, %v562_v19 }
  0xfc   : > { %v2828_v24 = vpop.f32.mrf.mxu0 }
  0xfd   : > { %2874 = vmatmul.mubr.msk.bf16.vlgmr.msra.gmra.mxu1 %vm665_vm2, %v617_v23 }
  0xfe   : > { %v570_v25 = vpop.f32.mrf.mxu0  ;;  %2878 = vmatpush3.bf16.msra.mxu1 %v3218_v22  ;;  %2885 = vmatprep.mubr.msk.bf16.mxu1 %vm3403_vm0, %v3402_v0 }
  0xff   : > { %2879 = vmatprep.subr.bf16.mxu1 %v3402_v0 }
 0x100   : > { %v2831_v27 = vpop.f32.mrf.mxu0 }
 0x102   : > { %v573_v28 = vpop.f32.mrf.mxu0  ;;  %2880 = vmatpush3.bf16.msra.mxu1 %v3220_v26 }
 0x103   : > { %v618_v31 = vpack.c.bf16 %v573_v28, %v570_v25  ;;  %2881 = vmatprep.subr.bf16.mxu1 %v3402_v0 }
 0x104   : > { %v2832_v32 = vpop.f32.mrf.mxu0 }
 0x105   : > { %2862 = vmatmul.mubr.msk.bf16.vlgmr.msra.gmra.mxu0 %vm665_vm2, %v618_v31 }
 0x106   : > { %v578_v33 = vpop.f32.mrf.mxu0  ;;  %2882 = vmatpush3.bf16.msra.mxu1 %v3221_v29  ;;  %2890 = vmatpush3.bf16.msra.mxu0 %v3222_v30 }
 0x107   : > { %2883 = vmatprep.subr.bf16.mxu1 %v3402_v0  ;;  %2891 = vmatprep.subr.bf16.mxu0 %v3402_v0 }
 0x108   : > { %v2835_v36 = vpop.f32.mrf.mxu0  ;;  %2897 = vmatprep.mubr.msk.bf16.mxu0 %vm3403_vm0, %v3402_v0 }
 0x10a   : > { %v581_v37 = vpop.f32.mrf.mxu0  ;;  %2884 = vmatpush3.bf16.msra.mxu1 %v3223_v34  ;;  %2892 = vmatpush3.bf16.msra.mxu0 %v3224_v35 }
 0x10b   : > { %v619_v40 = vpack.c.bf16 %v581_v37, %v578_v33  ;;  %2893 = vmatprep.subr.bf16.mxu0 %v3402_v0  ;;  %2901 = vmatprep.subr.bf16.mxu1 %v3402_v0 }
 0x10c   : > { %v2836_v41 = vpop.f32.mrf.mxu0 }
 0x10d   : > { %2886 = vmatmul.mubr.msk.bf16.vlgmr.msra.gmra.mxu1 %vm665_vm2, %v619_v40 }
 0x10e   : > { %v586_v42 = vpop.f32.mrf.mxu0  ;;  %2894 = vmatpush3.bf16.msra.mxu0 %v3225_v38  ;;  %2902 = vmatpush3.bf16.msra.mxu1 %v3226_v39 }
 0x10f   : > { %2895 = vmatprep.subr.bf16.mxu0 %v3402_v0  ;;  %2903 = vmatprep.subr.bf16.mxu1 %v3402_v0 }
 0x110   : > { %v2839_v45 = vpop.f32.mrf.mxu0  ;;  %2909 = vmatprep.mubr.msk.bf16.mxu1 %vm3403_vm0, %v3402_v0 }
 0x112   : > { %v589_v46 = vpop.f32.mrf.mxu0  ;;  %2896 = vmatpush3.bf16.msra.mxu0 %v3227_v43  ;;  %2904 = vmatpush3.bf16.msra.mxu1 %v3228_v44 }
 0x113   : > { %v620_v49 = vpack.c.bf16 %v589_v46, %v586_v42  ;;  %2905 = vmatprep.subr.bf16.mxu1 %v3402_v0  ;;  %2913 = vmatprep.subr.bf16.mxu0 %v3402_v0 }
 0x114   : > { %v2840_v50 = vpop.f32.mrf.mxu0 }
 0x115   : > { %2898 = vmatmul.mubr.msk.bf16.vlgmr.msra.gmra.mxu0 %vm665_vm2, %v620_v49 }
 0x116   : > { %v594_v51 = vpop.f32.mrf.mxu0  ;;  %2906 = vmatpush3.bf16.msra.mxu1 %v3229_v47  ;;  %2914 = vmatpush3.bf16.msra.mxu0 %v3230_v48 }
 0x117   : > { %2907 = vmatprep.subr.bf16.mxu1 %v3402_v0  ;;  %2915 = vmatprep.subr.bf16.mxu0 %v3402_v0 }
 0x118   : > { %v2843_v54 = vpop.f32.mrf.mxu0  ;;  %2921 = vmatprep.mubr.msk.bf16.mxu0 %vm3403_vm0, %v3402_v0 }
 0x11a   : > { %v597_v55 = vpop.f32.mrf.mxu0  ;;  %2908 = vmatpush3.bf16.msra.mxu1 %v3231_v52  ;;  %2916 = vmatpush3.bf16.msra.mxu0 %v3232_v53  ;;  %v2507_v53 = vld [vmem:[%s4054_s3] ss:$0 sm:$0xff] }
 0x11b   : > { %v621_v58 = vpack.c.bf16 %v597_v55, %v594_v51  ;;  %2917 = vmatprep.subr.bf16.mxu0 %v3402_v0  ;;  %2925 = vmatprep.subr.bf16.mxu1 %v3402_v0 }
 0x11c   : > { %v2844_v59 = vpop.f32.mrf.mxu0 }
 0x11d   : > { %2910 = vmatmul.mubr.msk.bf16.vlgmr.msra.gmra.mxu1 %vm665_vm2, %v621_v58 }
 0x11e   : > { %v602_v60 = vpop.f32.mrf.mxu0  ;;  %2918 = vmatpush3.bf16.msra.mxu0 %v3233_v56  ;;  %2926 = vmatpush3.bf16.msra.mxu1 %v3234_v57 }
 0x11f   : > { %2919 = vmatprep.subr.bf16.mxu0 %v3402_v0  ;;  %2927 = vmatprep.subr.bf16.mxu1 %v3402_v0 }
 0x120   : > { %v2847_v63 = vpop.f32.mrf.mxu0  ;;  %2933 = vmatprep.mubr.msk.bf16.mxu1 %vm3403_vm0, %v3402_v0 }
 0x122   : > { %v605_v1 = vpop.f32.mrf.mxu0  ;;  %2920 = vmatpush3.bf16.msra.mxu0 %v3235_v61  ;;  %2928 = vmatpush3.bf16.msra.mxu1 %v3236_v62 }
 0x123   : > { %v622_v3 = vpack.c.bf16 %v605_v1, %v602_v60  ;;  %2929 = vmatprep.subr.bf16.mxu1 %v3402_v0  ;;  %v3240_v1 = vld [vmem:[%s4055_s4 + $0x8] sm:$0xff]  }
 0x124   : > { %v2848_v4 = vpop.f32.mrf.mxu0 }
 0x125   : > { %2922 = vmatmul.mubr.msk.bf16.vlgmr.msra.gmra.mxu0 %vm665_vm2, %v622_v3  ;;  %v3243_v3 = vld [vmem:[%s4056_s5 + $0x30] sm:$0xff]   ;;  %v3245_v4 = vld [vmem:[%s4056_s5 + $0x28] sm:$0xff]  }
 0x126   : > { %v610_v5 = vpop.f32.mrf.mxu0  ;;  %2930 = vmatpush3.bf16.msra.mxu1 %v3237_v2  ;;  %2939 = vmatprep.mubr.msk.bf16.mxu0 %vm506_vm1, %v3239_v11  ;;  %v3241_v2 = vld [vmem:[%s4056_s5 + $0x38] sm:$0xff]   ;;  %v3256_v11 = vld [vmem:[%s4056_s5 + $0x40] sm:$0xff]  }
 0x127   : > { %2931 = vmatprep.subr.bf16.mxu1 %v3402_v0 }
 0x128   : > { %v2851_v7 = vpop.f32.mrf.mxu0 }
 0x129   : > { %v3251_v7 = vld [vmem:[%s4056_s5 + $0x10] sm:$0xff]  }
 0x12a   : > { %v613_v8 = vpop.f32.mrf.mxu0  ;;  %2932 = vmatpush3.bf16.msra.mxu1 %v3238_v6  ;;  %v3249_v6 = vld [vmem:[%s4056_s5 + $0x18] sm:$0xff]  }
 0x12b   : > { %v623_v9 = vpack.c.bf16 %v613_v8, %v610_v5  ;;  %2943 = vmatprep.subr.bf16.mxu1 %v3402_v0  ;;  %v3247_v5 = vld [vmem:[%s4056_s5 + $0x20] sm:$0xff]   ;;  %v3253_v8 = vld [vmem:[%s4056_s5 + $0x8] sm:$0xff]  }
 0x12c   : > { %v2852_v10 = vpop.f32.mrf.mxu0 }
 0x12d   : > { %2934 = vmatmul.mubr.msk.bf16.vlgmr.msra.gmra.mxu1 %vm665_vm2, %v623_v9  ;;  %v3254_v9 = vld [vmem:[%s4056_s5 + $0x48] sm:$0xff]   ;;  %v3255_v10 = vld [vmem:[%s4056_s5] sm:$0xff]  }
 0x12e   : > { %2959 = vmatprep.mubr.msk.bf16.mxu1 %vm3403_vm0, %v3402_v0  ;;  %2944 = vmatpush3.bf16.msra.mxu1 %v3242_v12 }
 0x12f   : > { %2945 = vmatprep.subr.bf16.mxu1 %v3402_v0 }
 0x132   : > { %2946 = vmatpush3.bf16.msra.mxu1 %v3244_v13 }
 0x133   : > { %2947 = vmatprep.subr.bf16.mxu1 %v3402_v0 }
 0x136   : > { %2948 = vmatpush3.bf16.msra.mxu1 %v3246_v14 }
 0x137   : > { %2949 = vmatprep.subr.bf16.mxu1 %v3402_v0 }
 0x13a   : > { %2950 = vmatpush3.bf16.msra.mxu1 %v3248_v15 }
 0x13b   : > { %2951 = vmatprep.subr.bf16.mxu1 %v3402_v0 }
 0x13e   : > { %2952 = vmatpush3.bf16.msra.mxu1 %v3250_v16  ;;  %v3257_v16 = vld [vmem:[%s4056_s5 + $0xf8] sm:$0xff]  }
 0x13f   : > { %2953 = vmatprep.subr.bf16.mxu1 %v3402_v0 }
 0x142   : > { %2954 = vmatpush3.bf16.msra.mxu1 %v3252_v17 }
 0x143   : > { %2955 = vmatprep.subr.bf16.mxu1 %v3402_v0 }
 0x146   : > { %2956 = vmatpush3.bf16.msra.mxu1 %v3254_v9  ;;  %v3283_v9 = vld [vmem:[%s4059_s8 + $0x18] sm:$0xff]  }
 0x147   : > { %2957 = vmatprep.subr.bf16.mxu1 %v3402_v0 }
 0x14a   : > { %2958 = vmatpush3.bf16.msra.mxu1 %v3256_v11  ;;  %v3287_v11 = vld [vmem:[%s4059_s8 + $0x8] sm:$0xff]  }
 0x14b   : > { %2983 = vmatprep.subr.bf16.mxu1 %v3402_v0 }
 0x1bd   : > { %v771_v18 = vpop.f32.mrf.mxu1 }
 0x1bf   : > { %v2875_v19 = vpop.f32.mrf.mxu1 }
 0x1c1   : > { %v774_v20 = vpop.f32.mrf.mxu1 }
 0x1c3   : > { %v2876_v21 = vpop.f32.mrf.mxu1 }
 0x1c4   : > { %v3260_v21 = vld [vmem:[%s4056_s5 + $0xb0] sm:$0xff]  }
 0x1c5   : > { %v703_v22 = vpop.f32.mrf.mxu0 }
 0x1c6   : > { %v772_v38 = vadd.f32 %v771_v18, %v703_v22  ;;  %v3258_v18 = vld [vmem:[%s4056_s5 + $0xb8] sm:$0xff]   ;;  %v3261_v22 = vld [vmem:[%s4056_s5 + $0xe8] sm:$0xff]  }
 0x1c7   : > { %v2863_v23 = vpop.f32.mrf.mxu0 }
 0x1c8   : > { %v3262_v23 = vld [vmem:[%s4056_s5 + $0xa8] sm:$0xff]  }
 0x1c9   : > { %v706_v24 = vpop.f32.mrf.mxu0 }
 0x1ca   : > { %v775_v42 = vadd.f32 %v774_v20, %v706_v24  ;;  %v3259_v20 = vld [vmem:[%s4056_s5 + $0xf0] sm:$0xff]   ;;  %v3263_v24 = vld [vmem:[%s4056_s5 + $0xe0] sm:$0xff]  }
 0x1cb   : > { %v2864_v25 = vpop.f32.mrf.mxu0 }
 0x1cc   : > { %v3264_v25 = vld [vmem:[%s4056_s5 + $0xa0] sm:$0xff]  }
 0x1cd   : > { %v848_v26 = vpop.f32.mrf.mxu1 }
 0x1ce   : > { %v855_v40 = vadd.f32 %v848_v26, %v772_v38  ;;  %v3265_v26 = vld [vmem:[%s4056_s5 + $0xd8] sm:$0xff]   ;;  %v3278_v38 = vld [vmem:[%s4059_s8 + $0x70] sm:$0xff]  }
 0x1cf   : > { %v2887_v27 = vpop.f32.mrf.mxu1 }
 0x1d0   : > { %v3266_v27 = vld [vmem:[%s4056_s5 + $0x98] sm:$0xff]  }
 0x1d1   : > { %v851_v28 = vpop.f32.mrf.mxu1 }
 0x1d2   : > { %v856_v45 = vadd.f32 %v851_v28, %v775_v42  ;;  %v3267_v28 = vld [vmem:[%s4056_s5 + $0xd0] sm:$0xff]  }
 0x1d3   : > { %v2888_v29 = vpop.f32.mrf.mxu1  ;;  %v3286_v42 = vld [vmem:[%s4059_s8 + $0x50] sm:$0xff]  }
 0x1d4   : > { %v3268_v29 = vld [vmem:[%s4056_s5 + $0x90] sm:$0xff]  }
 0x1d5   : > { %v927_v30 = vpop.f32.mrf.mxu0 }
 0x1d6   : > { %v934_v43 = vadd.f32 %v927_v30, %v855_v40  ;;  %v3269_v30 = vld [vmem:[%s4056_s5 + $0xc8] sm:$0xff]   ;;  %v3282_v40 = vld [vmem:[%s4059_s8 + $0x60] sm:$0xff]  }
 0x1d7   : > { %v2899_v31 = vpop.f32.mrf.mxu0 }
 0x1d8   : > { %v3270_v31 = vld [vmem:[%s4056_s5 + $0x88] sm:$0xff]  }
 0x1d9   : > { %v930_v32 = vpop.f32.mrf.mxu0 }
 0x1da   : > { %v935_v48 = vadd.f32 %v930_v32, %v856_v45  ;;  %v3271_v32 = vld [vmem:[%s4056_s5 + $0xc0] sm:$0xff]  }
 0x1db   : > { %v2900_v33 = vpop.f32.mrf.mxu0 }
 0x1dd   : > { %v1006_v34 = vpop.f32.mrf.mxu1 }
 0x1de   : > { %v1013_v46 = vadd.f32 %v1006_v34, %v934_v43  ;;  %v3272_v34 = vld [vmem:[%s4056_s5 + $0x80] sm:$0xff]  }
 0x1df   : > { %v2911_v35 = vpop.f32.mrf.mxu1 }
 0x1e1   : > { %v1009_v36 = vpop.f32.mrf.mxu1 }
 0x1e2   : > { %v1014_v51 = vadd.f32 %v1009_v36, %v935_v48  ;;  %v3273_v36 = vld [vmem:[%s4058_s7] sm:$0xff]  }
 0x1e3   : > { %v2912_v37 = vpop.f32.mrf.mxu1 }
 0x1e4   : > { %v3276_v37 = vld [vmem:[%s4059_s8 + $0x78] sm:$0xff]  }
 0x1e5   : > { %v1085_v39 = vpop.f32.mrf.mxu0 }
 0x1e6   : > { %v1092_v49 = vadd.f32 %v1085_v39, %v1013_v46  ;;  %v3280_v39 = vld [vmem:[%s4059_s8 + $0x68] sm:$0xff]  }
 0x1e7   : > { %v2923_v41 = vpop.f32.mrf.mxu0 }
 0x1e8   : > { %v3284_v41 = vld [vmem:[%s4059_s8 + $0x58] sm:$0xff]  }
 0x1e9   : > { %v1088_v44 = vpop.f32.mrf.mxu0 }
 0x1ea   : > { %v1093_v55 = vadd.f32 %v1088_v44, %v1014_v51 }
 0x1eb   : > { %v2924_v47 = vpop.f32.mrf.mxu0 }
 0x1ed   : > { %v1164_v50 = vpop.f32.mrf.mxu1 }
 0x1ee   : > { %v1171_v52 = vadd.f32 %v1164_v50, %v1092_v49 }
 0x1ef   : > { %v2935_v54 = vpop.f32.mrf.mxu1 }
 0x1f0   : > { %v1180_v57 = vadd.f32 %v2507_v53, %v1171_v52 }
 0x1f1   : > { %v1167_v56 = vpop.f32.mrf.mxu1 }
 0x1f2   : > { %v1172_v58 = vadd.f32 %v1167_v56, %v1093_v55  ;;  %v1182_v61 = vmax.f32 %v1180_v57, 0.0  ;;  %v2592_v56 = vld [vmem:[%s4057_s6] ss:$0 sm:$0xff] }
 0x1f3   : > { %v2936_v59 = vpop.f32.mrf.mxu1 }
 0x1f4   : > { %v1181_v60 = vadd.f32 %v2507_v53, %v1172_v58 }
 0x1f6   : > { %v1183_v62 = vmax.f32 %v1181_v60, 0.0 }
 0x1f8   : > { %v1184_v63 = vpack.c.bf16 %v1183_v62, %v1182_v61 }
 0x1fa   : > { %2937 = vmatprep.subr.bf16.mxu0 %v1184_v63 }
 0x1fb   : > { %2938 = vmatpush3.bf16.msra.mxu0 %v1184_v63 }
 0x1fc   : > { %2963 = vmatprep.subr.bf16.mxu0 %v3402_v0 }
 0x1fe   : > { %2940 = vmatmul.mubr.msk.bf16.vlgmr.msra.gmra.mxu0 %vm506_vm1, %v3240_v1 }
 0x1ff   : > { %2964 = vmatpush3.bf16.msra.mxu0 %v3241_v2  ;;  %2979 = vmatprep.mubr.msk.bf16.mxu0 %vm3403_vm0, %v3402_v0 }
 0x200   : > { %2965 = vmatprep.subr.bf16.mxu0 %v3402_v0 }
 0x203   : > { %2966 = vmatpush3.bf16.msra.mxu0 %v3243_v3 }
 0x204   : > { %2967 = vmatprep.subr.bf16.mxu0 %v3402_v0 }
 0x207   : > { %2968 = vmatpush3.bf16.msra.mxu0 %v3245_v4  ;;  %v3274_v4 = vld [vmem:[%s4058_s7 + $0x8] sm:$0xff]  }
 0x208   : > { %2969 = vmatprep.subr.bf16.mxu0 %v3402_v0 }
 0x20b   : > { %2970 = vmatpush3.bf16.msra.mxu0 %v3247_v5  ;;  %v3275_v5 = vld [vmem:[%s4059_s8 + $0x38] sm:$0xff]  }
 0x20c   : > { %2971 = vmatprep.subr.bf16.mxu0 %v3402_v0 }
 0x20f   : > { %2972 = vmatpush3.bf16.msra.mxu0 %v3249_v6  ;;  %v3277_v6 = vld [vmem:[%s4059_s8 + $0x30] sm:$0xff]  }
 0x210   : > { %2973 = vmatprep.subr.bf16.mxu0 %v3402_v0 }
 0x213   : > { %2974 = vmatpush3.bf16.msra.mxu0 %v3251_v7  ;;  %v3279_v7 = vld [vmem:[%s4059_s8 + $0x28] sm:$0xff]  }
 0x214   : > { %2975 = vmatprep.subr.bf16.mxu0 %v3402_v0 }
 0x217   : > { %2976 = vmatpush3.bf16.msra.mxu0 %v3253_v8  ;;  %v3281_v8 = vld [vmem:[%s4059_s8 + $0x20] sm:$0xff]  }
 0x218   : > { %2977 = vmatprep.subr.bf16.mxu0 %v3402_v0 }
 0x21b   : > { %2978 = vmatpush3.bf16.msra.mxu0 %v3255_v10  ;;  %v3285_v10 = vld [vmem:[%s4059_s8 + $0x10] sm:$0xff]  }
 0x21c   : > { %3003 = vmatprep.subr.bf16.mxu0 %v3402_v0 }
 0x2be   : > { %v2941_v12 = vpop.f32.mrf.mxu0 }
 0x2c0   : > { %v1239_v13 = vpop.f32.mrf.mxu0 }
 0x2c2   : > { %v2942_v14 = vpop.f32.mrf.mxu0 }
 0x2c3   : > { %v1255_v33 = vpack.c.bf16 %v2942_v14, %v2941_v12  ;;  %v3288_v12 = vld [vmem:[%s4059_s8 + $0x48] sm:$0xff]   ;;  %v3290_v14 = vld [vmem:[%s4059_s8 + $0x40] sm:$0xff]  }
 0x2c4   : > { %v1242_v15 = vpop.f32.mrf.mxu0 }
 0x2c5   : > { %v1254_v17 = vpack.c.bf16 %v1242_v15, %v1239_v13  ;;  %v1592_v35 = vrot.slane %v1255_v33, 4  ;;  %v3289_v13 = vld [vmem:[%s4059_s8] sm:$0xff]  }
 0x2c7   : > { %v1290_v19 = vrot.slane %v1254_v17, 4  ;;  %2980 = vmatmul.mubr.bf16.vlgmr.msra.gmra.mxu0 %v1254_v17 }
 0x2c8   : > { %3004 = vmatpush3.bf16.msra.mxu0 %v3257_v16  ;;  %3019 = vmatprep.mubr.msk.bf16.mxu0 %vm3403_vm0, %v3402_v0 }
 0x2c9   : > { %2960 = vmatmul.mubr.bf16.vlgmr.msra.gmra.mxu1 %v1290_v19  ;;  %3005 = vmatprep.subr.bf16.mxu0 %v3402_v0  ;;  %v3291_v19 = vld [vmem:[%s4059_s8 + $0xf8] sm:$0xff]  }
 0x2ca   : > { %2984 = vmatpush3.bf16.msra.mxu1 %v3258_v18  ;;  %2999 = vmatprep.mubr.msk.bf16.mxu1 %vm3403_vm0, %v3402_v0 }
 0x2cb   : > { %2985 = vmatprep.subr.bf16.mxu1 %v3402_v0 }
 0x2cc   : > { %3006 = vmatpush3.bf16.msra.mxu0 %v3259_v20 }
 0x2cd   : > { %3007 = vmatprep.subr.bf16.mxu0 %v3402_v0 }
 0x2ce   : > { %2986 = vmatpush3.bf16.msra.mxu1 %v3260_v21  ;;  %v3292_v21 = vld [vmem:[%s4059_s8 + $0xb8] sm:$0xff]  }
 0x2cf   : > { %2987 = vmatprep.subr.bf16.mxu1 %v3402_v0 }
 0x2d0   : > { %3008 = vmatpush3.bf16.msra.mxu0 %v3261_v22 }
 0x2d1   : > { %3009 = vmatprep.subr.bf16.mxu0 %v3402_v0 }
 0x2d2   : > { %2988 = vmatpush3.bf16.msra.mxu1 %v3262_v23  ;;  %v3293_v23 = vld [vmem:[%s4059_s8 + $0xf0] sm:$0xff]  }
 0x2d3   : > { %2989 = vmatprep.subr.bf16.mxu1 %v3402_v0 }
 0x2d4   : > { %3010 = vmatpush3.bf16.msra.mxu0 %v3263_v24  ;;  %v3294_v24 = vld [vmem:[%s4059_s8 + $0xb0] sm:$0xff]  }
 0x2d5   : > { %3011 = vmatprep.subr.bf16.mxu0 %v3402_v0 }
 0x2d6   : > { %2990 = vmatpush3.bf16.msra.mxu1 %v3264_v25  ;;  %v3295_v25 = vld [vmem:[%s4059_s8 + $0xe8] sm:$0xff]  }
 0x2d7   : > { %2991 = vmatprep.subr.bf16.mxu1 %v3402_v0 }
 0x2d8   : > { %3012 = vmatpush3.bf16.msra.mxu0 %v3265_v26  ;;  %v3296_v26 = vld [vmem:[%s4059_s8 + $0xa8] sm:$0xff]  }
 0x2d9   : > { %3013 = vmatprep.subr.bf16.mxu0 %v3402_v0 }
 0x2da   : > { %2992 = vmatpush3.bf16.msra.mxu1 %v3266_v27  ;;  %v3297_v27 = vld [vmem:[%s4059_s8 + $0xe0] sm:$0xff]  }
 0x2db   : > { %2993 = vmatprep.subr.bf16.mxu1 %v3402_v0 }
 0x2dc   : > { %3014 = vmatpush3.bf16.msra.mxu0 %v3267_v28  ;;  %v3298_v28 = vld [vmem:[%s4059_s8 + $0xa0] sm:$0xff]  }
 0x2dd   : > { %3015 = vmatprep.subr.bf16.mxu0 %v3402_v0 }
 0x2de   : > { %2994 = vmatpush3.bf16.msra.mxu1 %v3268_v29  ;;  %v3299_v29 = vld [vmem:[%s4059_s8 + $0xd8] sm:$0xff]  }
 0x2df   : > { %2995 = vmatprep.subr.bf16.mxu1 %v3402_v0 }
 0x2e0   : > { %3016 = vmatpush3.bf16.msra.mxu0 %v3269_v30  ;;  %v3300_v30 = vld [vmem:[%s4059_s8 + $0x98] sm:$0xff]  }
 0x2e1   : > { %3017 = vmatprep.subr.bf16.mxu0 %v3402_v0 }
 0x2e2   : > { %2996 = vmatpush3.bf16.msra.mxu1 %v3270_v31  ;;  %v3301_v31 = vld [vmem:[%s4059_s8 + $0xd0] sm:$0xff]  }
 0x2e3   : > { %2997 = vmatprep.subr.bf16.mxu1 %v3402_v0 }
 0x2e4   : > { %3018 = vmatpush3.bf16.msra.mxu0 %v3271_v32  ;;  %v3302_v32 = vld [vmem:[%s4059_s8 + $0x90] sm:$0xff]  }
 0x2e5   : > { %3029 = vmatprep.subr.bf16.mxu0 %v3402_v0 }
 0x2e6   : > { %2998 = vmatpush3.bf16.msra.mxu1 %v3272_v34  ;;  %v3304_v34 = vld [vmem:[%s4059_s8 + $0x88] sm:$0xff]  }
 0x2e7   : > { %3020 = vmatmul.mubr.bf16.vlgmr.msra.gmra.mxu0 %v1592_v35  ;;  %v3305_v35 = vld [vmem:[%s4059_s8 + $0xc0] sm:$0xff]  }
 0x2e8   : > { %3045 = vmatprep.mubr.msk.bf16.mxu0 %vm3403_vm0, %v3402_v0  ;;  %3030 = vmatpush3.bf16.msra.mxu0 %v3276_v37  ;;  %v3306_v37 = vld [vmem:[%s4059_s8 + $0x80] sm:$0xff]  }
 0x2e9   : > { %3000 = vmatmul.mubr.bf16.vlgmr.msra.gmra.mxu1 %v1255_v33  ;;  %3031 = vmatprep.subr.bf16.mxu0 %v3402_v0  ;;  %v3303_v33 = vld [vmem:[%s4059_s8 + $0xc8] sm:$0xff]  }
 0x2ea   : > { %3025 = vmatprep.mubr.msk.bf16.mxu1 %vm1707_vm3, %v3273_v36 }
 0x2ec   : > { %3032 = vmatpush3.bf16.msra.mxu0 %v3278_v38 }
 0x2ed   : > { %3033 = vmatprep.subr.bf16.mxu0 %v3402_v0 }
 0x2f0   : > { %3034 = vmatpush3.bf16.msra.mxu0 %v3280_v39  ;;  %v2296_v39 = vld [vmem:[%s4062_s11 + $0x78] sm:$0xff] }
 0x2f1   : > { %3035 = vmatprep.subr.bf16.mxu0 %v3402_v0 }
 0x2f4   : > { %3036 = vmatpush3.bf16.msra.mxu0 %v3282_v40  ;;  %v2295_v40 = vld [vmem:[%s4062_s11 + $0x70] sm:$0xff] }
 0x2f5   : > { %3037 = vmatprep.subr.bf16.mxu0 %v3402_v0 }
 0x2f8   : > { %3038 = vmatpush3.bf16.msra.mxu0 %v3284_v41  ;;  %v2294_v41 = vld [vmem:[%s4062_s11 + $0x68] sm:$0xff] }
 0x2f9   : > { %3039 = vmatprep.subr.bf16.mxu0 %v3402_v0 }
 0x2fc   : > { %3040 = vmatpush3.bf16.msra.mxu0 %v3286_v42  ;;  %v2293_v42 = vld [vmem:[%s4062_s11 + $0x60] sm:$0xff] }
 0x2fd   : > { %3041 = vmatprep.subr.bf16.mxu0 %v3402_v0 }
 0x300   : > { %3042 = vmatpush3.bf16.msra.mxu0 %v3288_v12 }
 0x301   : > { %3043 = vmatprep.subr.bf16.mxu0 %v3402_v0 }
 0x304   : > { %3044 = vmatpush3.bf16.msra.mxu0 %v3290_v14  ;;  %v2206_v14 = vld [vmem:[%s4061_s10] sm:$0x1] }
 0x305   : > { %3069 = vmatprep.subr.bf16.mxu0 %v3402_v0 }
 0x387   : > { %v1462_v43 = vpop.f32.mrf.mxu0 }
 0x389   : > { %v1374_v44 = vpop.f32.mrf.mxu1  ;;  %v2981_v45 = vpop.f32.mrf.mxu0 }
 0x38a   : > { %v1463_v52 = vadd.f32 %v1462_v43, %v1374_v44  ;;  %v2292_v43 = vld [vmem:[%s4062_s11 + $0x58] sm:$0xff]  ;;  %v2291_v44 = vld [vmem:[%s4062_s11 + $0x50] sm:$0xff]  ;;  %v2290_v45 = vld [vmem:[%s4062_s11 + $0x48] sm:$0xff] }
 0x38b   : > { %v2961_v46 = vpop.f32.mrf.mxu1  ;;  %v1465_v47 = vpop.f32.mrf.mxu0 }
 0x38c   : > { %v2289_v46 = vld [vmem:[%s4062_s11 + $0x40] sm:$0xff]  ;;  %v2288_v47 = vld [vmem:[%s4062_s11 + $0x38] sm:$0xff] }
 0x38d   : > { %v1377_v48 = vpop.f32.mrf.mxu1  ;;  %v2982_v49 = vpop.f32.mrf.mxu0 }
 0x38e   : > { %v2287_v48 = vld [vmem:[%s4062_s11 + $0x30] sm:$0xff]  ;;  %v2286_v49 = vld [vmem:[%s4062_s11 + $0x28] sm:$0xff] }
 0x38f   : > { %v2962_v50 = vpop.f32.mrf.mxu1 }
 0x390   : > { %v2285_v50 = vld [vmem:[%s4062_s11 + $0x20] sm:$0xff] }
 0x3a7   : > { %v1676_v51 = vpop.f32.mrf.mxu0 }
 0x3a9   : > { %v1567_v53 = vpop.f32.mrf.mxu1  ;;  %v3021_v54 = vpop.f32.mrf.mxu0 }
 0x3aa   : > { %v1573_v55 = vadd.f32 %v1567_v53, %v1463_v52  ;;  %v2283_v52 = vld [vmem:[%s4062_s11 + $0x10] sm:$0xff]  ;;  %v2282_v53 = vld [vmem:[%s4062_s11 + $0x8] sm:$0xff] }
 0x3ab   : > { %v3001_v57 = vpop.f32.mrf.mxu1  ;;  %v1679_v58 = vpop.f32.mrf.mxu0 }
 0x3ac   : > { %v1682_v59 = vadd.f32 %v1676_v51, %v1573_v55  ;;  %v2284_v51 = vld [vmem:[%s4062_s11 + $0x18] sm:$0xff] }
 0x3ad   : > { %v1570_v60 = vpop.f32.mrf.mxu1  ;;  %v3022_v61 = vpop.f32.mrf.mxu0 }
 0x3ae   : > { %v1690_v62 = vadd.f32 %v2592_v56, %v1682_v59 }
 0x3af   : > { %v3002_v63 = vpop.f32.mrf.mxu1 }
 0x3b0   : > { %v1691_v1 = vmax.f32 %v1690_v62, 0.0 }
 0x3b2   : > { %v1692_v2 = vpack.c.bf16 %v1691_v1, %v1691_v1 }
 0x3b4   : > { %3149 = vmatprep.subr.msk.bf16.mxu1 %vm1714_vm4, %v1692_v2  ;;  %v1716_v3 = vsel %vm1714_vm4, %v1692_v2, 0 }
 0x3b5   : > { %3024 = vmatpush3.bf16.msra.mxu1 %v1716_v3 }
 0x3b6   : > { %3049 = vmatprep.subr.bf16.mxu1 %v3402_v0 }
 0x3b8   : > { %3026 = vmatmul.mubr.msk.bf16.vlgmr.msra.gmra.mxu1 %vm1707_vm3, %v3274_v4  ;;  %v2677_v4 = vld [vmem:[%s4060_s9] ss:$0 sm:$0xff] }
 0x3b9   : > { %3050 = vmatpush3.bf16.msra.mxu1 %v3275_v5  ;;  %3065 = vmatprep.mubr.msk.bf16.mxu1 %vm3403_vm0, %v3402_v0 }
 0x3ba   : > { %3051 = vmatprep.subr.bf16.mxu1 %v3402_v0 }
 0x3bd   : > { %3052 = vmatpush3.bf16.msra.mxu1 %v3277_v6 }
 0x3be   : > { %3053 = vmatprep.subr.bf16.mxu1 %v3402_v0 }
 0x3c1   : > { %3054 = vmatpush3.bf16.msra.mxu1 %v3279_v7 }
 0x3c2   : > { %3055 = vmatprep.subr.bf16.mxu1 %v3402_v0 }
 0x3c5   : > { %3056 = vmatpush3.bf16.msra.mxu1 %v3281_v8 }
 0x3c6   : > { %3057 = vmatprep.subr.bf16.mxu1 %v3402_v0 }
 0x3c9   : > { %3058 = vmatpush3.bf16.msra.mxu1 %v3283_v9 }
 0x3ca   : > { %3059 = vmatprep.subr.bf16.mxu1 %v3402_v0 }
 0x3cd   : > { %3060 = vmatpush3.bf16.msra.mxu1 %v3285_v10 }
 0x3ce   : > { %3061 = vmatprep.subr.bf16.mxu1 %v3402_v0 }
 0x3d1   : > { %3062 = vmatpush3.bf16.msra.mxu1 %v3287_v11 }
 0x3d2   : > { %3063 = vmatprep.subr.bf16.mxu1 %v3402_v0 }
 0x3d5   : > { %3064 = vmatpush3.bf16.msra.mxu1 %v3289_v13 }
 0x3d6   : > { %3089 = vmatprep.subr.bf16.mxu1 %v3402_v0 }
 0x478   : > { %v3027_v15 = vpop.f32.mrf.mxu1 }
 0x47a   : > { %v1752_v16 = vpop.f32.mrf.mxu1 }
 0x47c   : > { %v3028_v17 = vpop.f32.mrf.mxu1 }
 0x47d   : > { %v1768_v36 = vpack.c.bf16 %v3028_v17, %v3027_v15  ;;  %v2281_v15 = vld [vmem:[%s4062_s11] sm:$0xff] }
 0x47e   : > { %v1755_v18 = vpop.f32.mrf.mxu1 }
 0x47f   : > { %v1767_v20 = vpack.c.bf16 %v1755_v18, %v1752_v16  ;;  %v2105_v38 = vrot.slane %v1768_v36, 4  ;;  %v2297_v18 = vld [vmem:[%s4063_s12] sm:$0x1] }
 0x481   : > { %v1803_v22 = vrot.slane %v1767_v20, 4  ;;  %3066 = vmatmul.mubr.bf16.vlgmr.msra.gmra.mxu1 %v1767_v20 }
 0x482   : > { %3090 = vmatpush3.bf16.msra.mxu1 %v3291_v19  ;;  %3105 = vmatprep.mubr.msk.bf16.mxu1 %vm3403_vm0, %v3402_v0 }
 0x483   : > { %3046 = vmatmul.mubr.bf16.vlgmr.msra.gmra.mxu0 %v1803_v22  ;;  %3091 = vmatprep.subr.bf16.mxu1 %v3402_v0 }
 0x484   : > { %3070 = vmatpush3.bf16.msra.mxu0 %v3292_v21  ;;  %3085 = vmatprep.mubr.msk.bf16.mxu0 %vm3403_vm0, %v3402_v0 }
 0x485   : > { %3071 = vmatprep.subr.bf16.mxu0 %v3402_v0 }
 0x486   : > { %3092 = vmatpush3.bf16.msra.mxu1 %v3293_v23 }
 0x487   : > { %3093 = vmatprep.subr.bf16.mxu1 %v3402_v0 }
 0x488   : > { %3072 = vmatpush3.bf16.msra.mxu0 %v3294_v24 }
 0x489   : > { %3073 = vmatprep.subr.bf16.mxu0 %v3402_v0 }
 0x48a   : > { %3094 = vmatpush3.bf16.msra.mxu1 %v3295_v25 }
 0x48b   : > { %3095 = vmatprep.subr.bf16.mxu1 %v3402_v0 }
 0x48c   : > { %3074 = vmatpush3.bf16.msra.mxu0 %v3296_v26 }
 0x48d   : > { %3075 = vmatprep.subr.bf16.mxu0 %v3402_v0 }
 0x48e   : > { %3096 = vmatpush3.bf16.msra.mxu1 %v3297_v27 }
 0x48f   : > { %3097 = vmatprep.subr.bf16.mxu1 %v3402_v0 }
 0x490   : > { %3076 = vmatpush3.bf16.msra.mxu0 %v3298_v28 }
 0x491   : > { %3077 = vmatprep.subr.bf16.mxu0 %v3402_v0 }
 0x492   : > { %3098 = vmatpush3.bf16.msra.mxu1 %v3299_v29 }
 0x493   : > { %3099 = vmatprep.subr.bf16.mxu1 %v3402_v0 }
 0x494   : > { %3078 = vmatpush3.bf16.msra.mxu0 %v3300_v30 }
 0x495   : > { %3079 = vmatprep.subr.bf16.mxu0 %v3402_v0 }
 0x496   : > { %3100 = vmatpush3.bf16.msra.mxu1 %v3301_v31 }
 0x497   : > { %3101 = vmatprep.subr.bf16.mxu1 %v3402_v0 }
 0x498   : > { %3080 = vmatpush3.bf16.msra.mxu0 %v3302_v32 }
 0x499   : > { %3081 = vmatprep.subr.bf16.mxu0 %v3402_v0 }
 0x49a   : > { %3102 = vmatpush3.bf16.msra.mxu1 %v3303_v33 }
 0x49b   : > { %3103 = vmatprep.subr.bf16.mxu1 %v3402_v0 }
 0x49c   : > { %3082 = vmatpush3.bf16.msra.mxu0 %v3304_v34 }
 0x49d   : > { %3083 = vmatprep.subr.bf16.mxu0 %v3402_v0 }
 0x49e   : > { %3104 = vmatpush3.bf16.msra.mxu1 %v3305_v35 }
 0x49f   : > { %3114 = vmatprep.subr.mxu1 %v3402_v0 }
 0x4a0   : > { %3084 = vmatpush3.bf16.msra.mxu0 %v3306_v37 }
 0x4a1   : > { %3106 = vmatmul.mubr.bf16.vlgmr.msra.gmra.mxu1 %v2105_v38  ;;  %3109 = vmatprep.subr.mxu0 %v3402_v0 }
 0x4a2   : > { %3146 = vmatprep.mubr.msk.f32.mxu1 %vm3403_vm0, %v3402_v0  ;;  %3115 = vmatpush3.msra.mxu1 %v2296_v39 }
 0x4a3   : > { %3086 = vmatmul.mubr.bf16.vlgmr.msra.gmra.mxu0 %v1768_v36  ;;  %3116 = vmatprep.subr.mxu1 %v3402_v0 }
 0x4a4   : > { %3111 = vmatprep.mubr.msk.f32.mxu0 %vm3403_vm0, %v3402_v0  ;;  %3117 = vmatpush3.msra.mxu1 %v2295_v40 }
 0x4a5   : > { %3118 = vmatprep.subr.mxu1 %v3402_v0 }
 0x4a6   : > { %3119 = vmatpush3.msra.mxu1 %v2294_v41 }
 0x4a7   : > { %3120 = vmatprep.subr.mxu1 %v3402_v0 }
 0x4a8   : > { %3121 = vmatpush3.msra.mxu1 %v2293_v42 }
 0x4a9   : > { %3122 = vmatprep.subr.mxu1 %v3402_v0 }
 0x4aa   : > { %3123 = vmatpush3.msra.mxu1 %v2292_v43 }
 0x4ab   : > { %3124 = vmatprep.subr.mxu1 %v3402_v0 }
 0x4ac   : > { %3125 = vmatpush3.msra.mxu1 %v2291_v44 }
 0x4ad   : > { %3126 = vmatprep.subr.mxu1 %v3402_v0 }
 0x4ae   : > { %3127 = vmatpush3.msra.mxu1 %v2290_v45 }
 0x4af   : > { %3128 = vmatprep.subr.mxu1 %v3402_v0 }
 0x4b0   : > { %3129 = vmatpush3.msra.mxu1 %v2289_v46 }
 0x4b1   : > { %3130 = vmatprep.subr.mxu1 %v3402_v0 }
 0x4b2   : > { %3131 = vmatpush3.msra.mxu1 %v2288_v47 }
 0x4b3   : > { %3132 = vmatprep.subr.mxu1 %v3402_v0 }
 0x4b4   : > { %3133 = vmatpush3.msra.mxu1 %v2287_v48 }
 0x4b5   : > { %3134 = vmatprep.subr.mxu1 %v3402_v0 }
 0x4b6   : > { %3135 = vmatpush3.msra.mxu1 %v2286_v49 }
 0x4b7   : > { %3136 = vmatprep.subr.mxu1 %v3402_v0 }
 0x4b8   : > { %3137 = vmatpush3.msra.mxu1 %v2285_v50 }
 0x4b9   : > { %3138 = vmatprep.subr.mxu1 %v3402_v0 }
 0x4ba   : > { %3139 = vmatpush3.msra.mxu1 %v2284_v51 }
 0x4bb   : > { %3140 = vmatprep.subr.mxu1 %v3402_v0 }
 0x4bc   : > { %3141 = vmatpush3.msra.mxu1 %v2283_v52 }
 0x4bd   : > { %3142 = vmatprep.subr.mxu1 %v3402_v0 }
 0x4be   : > { %3143 = vmatpush3.msra.mxu1 %v2282_v53 }
 0x4bf   : > { %3144 = vmatprep.subr.mxu1 %v3402_v0 }
 0x4c0   : > { %3145 = vmatpush3.msra.mxu1 %v2281_v15 }
 0x541   : > { %v1975_v54 = vpop.f32.mrf.mxu1 }
 0x543   : > { %v1887_v55 = vpop.f32.mrf.mxu0  ;;  %v3067_v56 = vpop.f32.mrf.mxu1 }
 0x544   : > { %v1976_v63 = vadd.f32 %v1975_v54, %v1887_v55 }
 0x545   : > { %v3047_v57 = vpop.f32.mrf.mxu0  ;;  %v1978_v58 = vpop.f32.mrf.mxu1 }
 0x547   : > { %v1890_v59 = vpop.f32.mrf.mxu0  ;;  %v3068_v60 = vpop.f32.mrf.mxu1 }
 0x549   : > { %v3048_v61 = vpop.f32.mrf.mxu0 }
 0x561   : > { %v2189_v62 = vpop.f32.mrf.mxu1 }
 0x563   : > { %v2080_v1 = vpop.f32.mrf.mxu0  ;;  %v3107_v2 = vpop.f32.mrf.mxu1 }
 0x564   : > { %v2086_v3 = vadd.f32 %v2080_v1, %v1976_v63 }
 0x565   : > { %v3087_v5 = vpop.f32.mrf.mxu0  ;;  %v2192_v6 = vpop.f32.mrf.mxu1 }
 0x566   : > { %v2195_v0 = vadd.f32 %v2189_v62, %v2086_v3 }
 0x567   : > { %v2083_v7 = vpop.f32.mrf.mxu0  ;;  %v3108_v8 = vpop.f32.mrf.mxu1 }
 0x568   : > { %v2203_v9 = vadd.f32 %v2677_v4, %v2195_v0 }
 0x569   : > { %v3088_v10 = vpop.f32.mrf.mxu0 }
 0x56a   : > { %v2204_v11 = vmax.f32 %v2203_v9, 0.0 }
 0x56c   : > { %v2205_v12 = vpack.c.bf16 %v2204_v11, %v2204_v11 }
 0x56e   : > { %v2207_v13 = vunpack.c.l.bf16 %v2205_v12 }
 0x570   : > { %3110 = vmatpush3.msra.mxu0 %v2207_v13 }
 0x571   : > { %3112 = vmatmul.mubr.msk.f32.vlgmr.msra.gmra.mxu0 %vm1707_vm3, %v2206_v14 }
 0x631   : > { %v2277_v16 = vpop.f32.mrf.mxu0 }
 0x632   : > { %3147 = vmatmul.mubr.f32.vlgmr.msra.gmra.mxu1 %v2277_v16 }
 0x633   : > { %v3113_v17 = vpop.f32.mrf.mxu0 }
 0x6f2   : > { %v2364_v19 = vpop.f32.mrf.mxu1 }
 0x6f3   : > { %v2365_v20 = vadd.f32 %v2364_v19, %v2297_v18 }
 0x6f4   : > { %v3148_v21 = vpop.f32.mrf.mxu1 }
 0x6f5   : > { %2369 = vst.msk [vmem:[%s447_s16] sm:$0x1] %vm2368_vm5, %v2365_v20 }
 0x6f6   : > { %3346 = shalt.err (!%p3343_p0)
}
 0x6f7   : > { %s3347_s0 = scalar_lea.hbm %s4016_s20, 16  ;;  %s3351_s15 = scalar_lea.hbm %s4064_s13, 32 }
 0x6f8   : > { %p3348_p1 = scmp.ne.s32.totalorder %s4016_s20, %s3347_s0  ;;  %p3352_p4 = scmp.lt.s32.totalorder %s4016_s20, %s4064_s13 }
 0x6f9   : > { %p3353_p7 = scmp.lt.s32.totalorder %s3351_s15, %s3347_s0 }
 0x6fa   : > { %p3349_p2 = pnand %p3348_p1, %p3513_p5 }
 0x6fb   : > { %p3354_p8 = por %p3353_p7, %p3352_p4 }
 0x6fc   : > { %p3350_p3 = pneg %p3349_p2 }
 0x6fe   : > { %p3355_p6 = pnand %p3354_p8, %p3350_p3 }
 0x700   : > { %3358 = shalt.err (!%p3355_p6)
}
 0x701   : > { %3154 = dma.vmem_to_hbm [thread:$0]  (%p3513_p5), %s2384_s21, 16, %s4016_s20, %s2371_s22  }
 0x702 PF: > { %p3166_p9 = scmp.ge.s32.totalorder %s3397_s28, 2  ;;  %s2395_s2 = sand.u32 1, %s3385_s25  }
 0x703   : > { %p4074_p10 = scmp.ne.s32.totalorder %s4069_s19, 0  ;;  %s2396_s24 = scalar_lea.sflag [#allocation4], %s2395_s2 }
 0x705   : > { %p3161_p11 = pnand %p3166_p9, %p4074_p10 }
 0x707   : > { %p3162_p12 = pneg %p3161_p11 }
 0x709   : > { %3380 = dma.done.wait (%p3162_p12), %s2396_s24, 16  }
 0x70a   : > { %3382 = vsyncadd (%p3162_p12), %s2396_s24, 4294967280  ;;  %p24_p13 = scmp.ge.s32.totalorder %s3500_s14, 4   ;;  %s4075_s25 = smov %s3389_s26 }
 0x70b   : > { %s4076_s26 = smov %s3393_s27  ;;  %s4077_s27 = smov %s3511_s17 }
 0x70c   : > { %s4078_s28 = smov %s3500_s14  ;;  %26 = sbr.rel (!%p24_p13) target bundleno = 8 (0x8), region = 124 }
 0x711   :  { %2400 = vsyncpa [#allocation3], 1 }
 0x712   :  { %2402 = vsyncpa [#allocation3 + $0x1], 1 }
 0x713   :  { %2403 = vsyncpa [#allocation4], 1 }
 0x714   :  { %2405 = vsyncpa [#allocation4 + $0x1], 1 }

</bundles_post_ra>
